<compile_context>
chip_gen: v7x
topology: tpu7x:2x2x1
jax: 0.10.0
libtpu: 0.0.40
codegen_flags: <defaults>
</compile_context>

<pallas_src>
import functools
import math

import jax
import jax.numpy as jnp
from jax import lax
from jax.experimental import pallas as pl
from jax.experimental.pallas import tpu as pltpu


# ----------------------------- model config ---------------------------------
SEQ = 8          # S
BATCH = 2        # B
EMBED = 32       # E
NHEAD = 4        # H
FFN = 64         # dim_feedforward
NUM_LAYERS = 2   # stacked identical layers (TEMPURA TransformerDecoder style)
LN_EPS = 1e-5
NEG_INF = -1e30  # additive key-padding mask value (large negative, avoids NaN rows)


def _layernorm(x, gamma, beta, eps=LN_EPS):
    mu = jnp.mean(x, axis=-1, keepdims=True)
    var = jnp.mean((x - mu) ** 2, axis=-1, keepdims=True)
    return (x - mu) * lax.rsqrt(var + eps) * gamma + beta


# ------------------------------ Pallas kernel --------------------------------
def decoder_layer_kernel(
    x_ref, pos_ref, kpm_ref,
    wqk_ref, bqk_ref, wv_ref, bv_ref, wo_ref, bo_ref,
    ln3g_ref, ln3b_ref, w1_ref, b1_ref, w2_ref, b2_ref,
    out_ref, attnw_ref,
    *, nhead: int,
):
    layer = pl.program_id(1)

    # Layer 0: seed the resident output block with this batch element's input tokens.
    # out_ref keeps the same block index across the layer axis, so it doubles as the
    # carried activation between layers (written back to HBM only once per batch element).
    @pl.when(layer == 0)
    def _():
        out_ref[0] = x_ref[0]

    x = out_ref[0]                     # (S, E) float32, carried activations
    pos = pos_ref[0]                   # (S, E)
    kpm = kpm_ref[0]                   # (1, S) additive 0 / NEG_INF key-padding mask

    S, E = x.shape
    D = E // nhead
    bf16 = jnp.bfloat16
    f32 = jnp.float32

    # ---- merged lane-dense projections: Q|K in one (S,E)x(E,2E) dot, V in (S,E)x(E,E) ----
    xp = (x + pos).astype(bf16)
    qk = jnp.dot(xp, wqk_ref[0], preferred_element_type=f32) + bqk_ref[0]            # (S, 2E)
    v = jnp.dot(x.astype(bf16), wv_ref[0], preferred_element_type=f32) + bv_ref[0]   # (S, E)

    # Per-head (H, D, S) views: 2-D transpose + sublane-aligned slices; head stacking is a
    # leading-axis concat (no lane relayouts). q was pre-scaled by 1/sqrt(D) on the host.
    qkT = qk.T                                                            # (2E, S)
    vT = v.T                                                              # (E, S)
    qh = jnp.stack([qkT[h * D:(h + 1) * D] for h in range(nhead)])        # (H, D, S)
    kh = jnp.stack([qkT[E + h * D:E + (h + 1) * D] for h in range(nhead)])
    vh = jnp.stack([vT[h * D:(h + 1) * D] for h in range(nhead)])

    # ---- per-head attention within this batch element only (f32 softmax math) ----
    scores = lax.dot_general(qh, kh, (((1,), (1,)), ((0,), (0,))),
                             preferred_element_type=f32)                  # (H, Sq, Sk)
    scores = scores + kpm[None]                                           # mask padded keys
    m = jnp.max(scores, axis=-1, keepdims=True)
    p = jnp.exp(scores - m)
    probs = p / jnp.sum(p, axis=-1, keepdims=True)   # exact normalization (probs are output)

    attnw_ref[0, 0] = jnp.mean(probs, axis=0)                             # (S, S) head-avg

    # ---- context + single merged output projection ----
    ctxT = lax.dot_general(vh, probs, (((2,), (2,)), ((0,), (0,))),
                           preferred_element_type=f32)                    # (H, D, Sq)
    ctx = jnp.concatenate([ctxT[h] for h in range(nhead)], axis=0).T      # (Sq, E) head-major
    attn_out = jnp.dot(ctx.astype(bf16), wo_ref[0],
                       preferred_element_type=f32) + bo_ref[0]            # (S, E)

    # ---- residual + norm3 + FFN + residual (matches the PyTorch layer; dropout = id) ----
    t = _layernorm(x + attn_out, ln3g_ref[0], ln3b_ref[0])
    h1 = jnp.maximum(
        jnp.dot(t.astype(bf16), w1_ref[0], preferred_element_type=f32) + b1_ref[0], 0.0)
    h2 = jnp.dot(h1.astype(bf16), w2_ref[0], preferred_element_type=f32) + b2_ref[0]

    out_ref[0] = t + h2                # next layer's input / final output for this batch


# -------------------------- host-side weight prep ----------------------------
def _prepare_params(params, nhead):
    """Pre-transpose (E-major contractions), merge Q|K, fold 1/sqrt(D) into Wq/bq,
    pre-cast matmul weights to bf16, stack over layers."""
    E = params[0]["w_out"].shape[0]
    D = E // nhead
    scale = 1.0 / math.sqrt(D)
    bf16 = jnp.bfloat16

    keys = ("w_qk", "b_qk", "w_v", "b_v", "w_o", "b_o",
            "ln3_g", "ln3_b", "w1", "b1", "w2", "b2")
    acc = {k: [] for k in keys}
    for p in params:
        w_in, b_in = p["w_in"], p["b_in"]
        wq_t = (w_in[0:E] * scale).T                       # (E_in, E_out), scale folded
        wk_t = w_in[E:2 * E].T
        wv_t = w_in[2 * E:3 * E].T
        acc["w_qk"].append(jnp.concatenate([wq_t, wk_t], axis=1).astype(bf16))   # (E, 2E)
        acc["b_qk"].append(jnp.concatenate([b_in[0:E] * scale, b_in[E:2 * E]])[None, :])
        acc["w_v"].append(wv_t.astype(bf16))               # (E, E)
        acc["b_v"].append(b_in[2 * E:3 * E][None, :])
        acc["w_o"].append(p["w_out"].T.astype(bf16))       # (E, E), head-major rows
        acc["b_o"].append(p["b_out"][None, :])
        acc["ln3_g"].append(p["ln3_g"][None, :])
        acc["ln3_b"].append(p["ln3_b"][None, :])
        acc["w1"].append(p["w1"].T.astype(bf16))           # (E, F)
        acc["b1"].append(p["b1"][None, :])
        acc["w2"].append(p["w2"].T.astype(bf16))           # (F, E)
        acc["b2"].append(p["b2"][None, :])
    return {k: jnp.stack(v, axis=0) for k, v in acc.items()}


# ------------------------------ wrapper ---------------------------------------
def transformer_decoder(global_input, input_key_padding_mask, position_embed, params):
    """PyTorch-compatible wrapper.

    global_input:   (S, B, E) float32
    key_padding_mask: (B, S) bool (True = ignore key)
    position_embed: (S, B, E) float32
    returns: output (S, B, E), weights (num_layers, B, S, S)
    """
    S, B, E = global_input.shape
    L = len(params)
    H = NHEAD

    x = jnp.transpose(global_input, (1, 0, 2))            # (B, S, E)
    pos = jnp.transpose(position_embed, (1, 0, 2))
    kpm_add = jnp.where(input_key_padding_mask, NEG_INF, 0.0).astype(jnp.float32)
    kpm_add = kpm_add.reshape(B, 1, S)                     # per-batch additive mask

    sp = _prepare_params(params, H)
    F = sp["w1"].shape[-1]

    batch_map = lambda b, l: (b, 0, 0)                     # same block across layers
    layer_map = lambda b, l: (l, 0, 0)                     # stream one layer's weights

    kernel = functools.partial(decoder_layer_kernel, nhead=H)

    out, attnw = pl.pallas_call(
        kernel,
        grid=(B, L),
        in_specs=[
            pl.BlockSpec((1, S, E), batch_map),            # x (tokens of this batch elem)
            pl.BlockSpec((1, S, E), batch_map),            # pos
            pl.BlockSpec((1, 1, S), batch_map),            # additive key-padding mask
            pl.BlockSpec((1, E, 2 * E), layer_map),        # w_qk (bf16, q pre-scaled)
            pl.BlockSpec((1, 1, 2 * E), layer_map),        # b_qk
            pl.BlockSpec((1, E, E), layer_map),            # w_v (bf16)
            pl.BlockSpec((1, 1, E), layer_map),            # b_v
            pl.BlockSpec((1, E, E), layer_map),            # w_o (bf16, pre-transposed)
            pl.BlockSpec((1, 1, E), layer_map),            # b_o
            pl.BlockSpec((1, 1, E), layer_map),            # ln3 gamma
            pl.BlockSpec((1, 1, E), layer_map),            # ln3 beta
            pl.BlockSpec((1, E, F), layer_map),            # w1 (bf16, pre-transposed)
            pl.BlockSpec((1, 1, F), layer_map),            # b1
            pl.BlockSpec((1, F, E), layer_map),            # w2 (bf16, pre-transposed)
            pl.BlockSpec((1, 1, E), layer_map),            # b2
        ],
        out_specs=[
            pl.BlockSpec((1, S, E), lambda b, l: (b, 0, 0)),      # final tokens (carried)
            pl.BlockSpec((1, 1, S, S), lambda b, l: (l, b, 0, 0)),  # per-layer attn weights
        ],
        out_shape=(
            jax.ShapeDtypeStruct((B, S, E), jnp.float32),
            jax.ShapeDtypeStruct((L, B, S, S), jnp.float32),
        ),
        compiler_params=pltpu.CompilerParams(
            dimension_semantics=("parallel", "arbitrary"),
        ),
    )(
        x, pos, kpm_add,
        sp["w_qk"], sp["b_qk"], sp["w_v"], sp["b_v"], sp["w_o"], sp["b_o"],
        sp["ln3_g"], sp["ln3_b"], sp["w1"], sp["b1"], sp["w2"], sp["b2"],
    )

    output = jnp.transpose(out, (1, 0, 2))                 # back to (S, B, E)
    return output, attnw


# ------------------------------ reference (plain JAX, f32) --------------------
def _ref_layer(x, pos, mask_add, p):
    # x: (B, S, E)
    E = x.shape[-1]
    D = E // NHEAD
    qk_in = x + pos
    w_in, b_in = p["w_in"], p["b_in"]
    q = qk_in @ w_in[:E].T + b_in[:E]
    k = qk_in @ w_in[E:2 * E].T + b_in[E:2 * E]
    v = x @ w_in[2 * E:].T + b_in[2 * E:]

    B, S, _ = x.shape
    qh = q.reshape(B, S, NHEAD, D).transpose(0, 2, 1, 3) / math.sqrt(D)
    kh = k.reshape(B, S, NHEAD, D).transpose(0, 2, 1, 3)
    vh = v.reshape(B, S, NHEAD, D).transpose(0, 2, 1, 3)
    scores = jnp.einsum("bhqd,bhkd->bhqk", qh, kh) + mask_add[:, None, :, :]
    probs = jax.nn.softmax(scores, axis=-1)
    ctx = jnp.einsum("bhqk,bhkd->bhqd", probs, vh).transpose(0, 2, 1, 3).reshape(B, S, E)
    attn_out = ctx @ p["w_out"].T + p["b_out"]
    attn_w = jnp.mean(probs, axis=1)                       # (B, S, S)

    t = _layernorm(x + attn_out, p["ln3_g"], p["ln3_b"])
    h = jnp.maximum(t @ p["w1"].T + p["b1"], 0.0)
    t2 = h @ p["w2"].T + p["b2"]
    return t + t2, attn_w                                  # no final norm (matches module)


def _ref_decoder(global_input, mask, pos, params):
    x = jnp.transpose(global_input, (1, 0, 2))
    pe = jnp.transpose(pos, (1, 0, 2))
    mask_add = jnp.where(mask, NEG_INF, 0.0).astype(jnp.float32)[:, None, :]   # (B, 1, S)
    ws = []
    for p in params:
        x, aw = _ref_layer(x, pe, mask_add, p)
        ws.append(aw)
    return jnp.transpose(x, (1, 0, 2)), jnp.stack(ws, axis=0)


# ------------------------------ params & main --------------------------------
def init_params(key, num_layers, embed_dim, ffn_dim):
    params = []
    for i in range(num_layers):
        ks = jax.random.split(jax.random.fold_in(key, i), 10)
        params.append({
            "w_in":  0.1 * jax.random.normal(ks[0], (3 * embed_dim, embed_dim), jnp.float32),
            "b_in":  0.01 * jax.random.normal(ks[1], (3 * embed_dim,), jnp.float32),
            "w_out": 0.1 * jax.random.normal(ks[2], (embed_dim, embed_dim), jnp.float32),
            "b_out": 0.01 * jax.random.normal(ks[3], (embed_dim,), jnp.float32),
            "ln3_g": 1.0 + 0.1 * jax.random.normal(ks[4], (embed_dim,), jnp.float32),
            "ln3_b": 0.01 * jax.random.normal(ks[5], (embed_dim,), jnp.float32),
            "w1":    0.1 * jax.random.normal(ks[6], (ffn_dim, embed_dim), jnp.float32),
            "b1":    0.01 * jax.random.normal(ks[7], (ffn_dim,), jnp.float32),
            "w2":    0.1 * jax.random.normal(ks[8], (embed_dim, ffn_dim), jnp.float32),
            "b2":    0.01 * jax.random.normal(ks[9], (embed_dim,), jnp.float32),
        })
    return params


if __name__ == "__main__":
    key = jax.random.PRNGKey(0)
    k_x, k_pos, k_p = jax.random.split(key, 3)

    # PyTorch convention: (seq, batch, embed)
    global_input = jax.random.normal(k_x, (SEQ, BATCH, EMBED), jnp.float32)
    position_embed = jax.random.normal(k_pos, (SEQ, BATCH, EMBED), jnp.float32)
    # key padding mask: (batch, seq), True = padded (ignored) key
    input_key_padding_mask = jnp.zeros((BATCH, SEQ), dtype=bool).at[1, SEQ - 2:].set(True)

    params = init_params(k_p, NUM_LAYERS, EMBED, FFN)

    out, weights = transformer_decoder(
        global_input, input_key_padding_mask, position_embed, params
    )
    out = jax.block_until_ready(out)
    weights = jax.block_until_ready(weights)

    assert out.shape == (SEQ, BATCH, EMBED)
    assert weights.shape == (NUM_LAYERS, BATCH, SEQ, SEQ)

    # cross-check against a pure-f32 JAX reference; kernel runs bf16 MXU operands with
    # f32 accumulation, so tolerances are set at bf16 level.
    ref_out, ref_w = _ref_decoder(global_input, input_key_padding_mask, position_embed, params)
    assert jnp.allclose(out, ref_out, rtol=5e-2, atol=5e-2), "output mismatch"
    assert jnp.allclose(weights, ref_w, rtol=2e-2, atol=2e-2), "attn weights mismatch"

    print("KERNEL_OK")
</pallas_src>

<mosaic_0001>
module attributes {stable_mosaic.version = 11 : i64} {
  func.func @decoder_layer_kernel(%arg0: i32, %arg1: i32, %arg2: memref<1x8x32xf32, #tpu.memory_space<vmem>>, %arg3: memref<1x8x32xf32, #tpu.memory_space<vmem>>, %arg4: memref<1x1x8xf32, #tpu.memory_space<vmem>>, %arg5: memref<1x32x64xbf16, #tpu.memory_space<vmem>>, %arg6: memref<1x1x64xf32, #tpu.memory_space<vmem>>, %arg7: memref<1x32x32xbf16, #tpu.memory_space<vmem>>, %arg8: memref<1x1x32xf32, #tpu.memory_space<vmem>>, %arg9: memref<1x32x32xbf16, #tpu.memory_space<vmem>>, %arg10: memref<1x1x32xf32, #tpu.memory_space<vmem>>, %arg11: memref<1x1x32xf32, #tpu.memory_space<vmem>>, %arg12: memref<1x1x32xf32, #tpu.memory_space<vmem>>, %arg13: memref<1x32x64xbf16, #tpu.memory_space<vmem>>, %arg14: memref<1x1x64xf32, #tpu.memory_space<vmem>>, %arg15: memref<1x64x32xbf16, #tpu.memory_space<vmem>>, %arg16: memref<1x1x32xf32, #tpu.memory_space<vmem>>, %arg17: memref<1x8x32xf32, #tpu.memory_space<vmem>>, %arg18: memref<1x1x8x8xf32, #tpu.memory_space<vmem>>) attributes {dimension_semantics = [#tpu.dimension_semantics<parallel>, #tpu.dimension_semantics<arbitrary>], iteration_bounds = array<i64: 2, 2>, scalar_prefetch = 0 : i64, scratch_operands = 0 : i64, tpu.core_type = #tpu.core_type<tc>, window_params = [{transform_indices = @transform_0, window_bounds = array<i64: 1, 8, 32>}, {transform_indices = @transform_1, window_bounds = array<i64: 1, 8, 32>}, {transform_indices = @transform_2, window_bounds = array<i64: 1, 1, 8>}, {transform_indices = @transform_3, window_bounds = array<i64: 1, 32, 64>}, {transform_indices = @transform_4, window_bounds = array<i64: 1, 1, 64>}, {transform_indices = @transform_5, window_bounds = array<i64: 1, 32, 32>}, {transform_indices = @transform_6, window_bounds = array<i64: 1, 1, 32>}, {transform_indices = @transform_7, window_bounds = array<i64: 1, 32, 32>}, {transform_indices = @transform_8, window_bounds = array<i64: 1, 1, 32>}, {transform_indices = @transform_9, window_bounds = array<i64: 1, 1, 32>}, {transform_indices = @transform_10, window_bounds = array<i64: 1, 1, 32>}, {transform_indices = @transform_11, window_bounds = array<i64: 1, 32, 64>}, {transform_indices = @transform_12, window_bounds = array<i64: 1, 1, 64>}, {transform_indices = @transform_13, window_bounds = array<i64: 1, 64, 32>}, {transform_indices = @transform_14, window_bounds = array<i64: 1, 1, 32>}, {transform_indices = @transform_15, window_bounds = array<i64: 1, 8, 32>}, {transform_indices = @transform_16, window_bounds = array<i64: 1, 1, 8, 8>}]} {
    %c0_i32 = arith.constant 0 : i32
    %0 = arith.cmpi eq, %arg1, %c0_i32 : i32
    %1 = arith.extui %0 : i1 to i32
    %c0_i32_0 = arith.constant 0 : i32
    %2 = arith.cmpi ne, %1, %c0_i32_0 : i32
    scf.if %2 {
      %c0_68 = arith.constant 0 : index
      %c0_69 = arith.constant 0 : index
      %c0_70 = arith.constant 0 : index
      %142 = vector.load %arg2[%c0_68, %c0_69, %c0_70] : memref<1x8x32xf32, #tpu.memory_space<vmem>>, vector<1x8x32xf32>
      %143 = vector.shape_cast %142 : vector<1x8x32xf32> to vector<8x32xf32>
      %c0_71 = arith.constant 0 : index
      %c0_72 = arith.constant 0 : index
      %c0_73 = arith.constant 0 : index
      %144 = vector.load %arg17[%c0_71, %c0_72, %c0_73] : memref<1x8x32xf32, #tpu.memory_space<vmem>>, vector<1x8x32xf32>
      %145 = vector.shape_cast %144 : vector<1x8x32xf32> to vector<8x32xf32>
      %146 = vector.shape_cast %143 : vector<8x32xf32> to vector<1x8x32xf32>
      tpu.vector_store %arg17[%c0_71, %c0_72, %c0_73], %146 {strides = array<i32>} : memref<1x8x32xf32, #tpu.memory_space<vmem>>, vector<1x8x32xf32>,
    } else {
    }
    %c0 = arith.constant 0 : index
    %c0_1 = arith.constant 0 : index
    %c0_2 = arith.constant 0 : index
    %3 = vector.load %arg17[%c0, %c0_1, %c0_2] : memref<1x8x32xf32, #tpu.memory_space<vmem>>, vector<1x8x32xf32>
    %4 = vector.shape_cast %3 : vector<1x8x32xf32> to vector<8x32xf32>
    %c0_3 = arith.constant 0 : index
    %c0_4 = arith.constant 0 : index
    %c0_5 = arith.constant 0 : index
    %5 = vector.load %arg3[%c0_3, %c0_4, %c0_5] : memref<1x8x32xf32, #tpu.memory_space<vmem>>, vector<1x8x32xf32>
    %6 = vector.shape_cast %5 : vector<1x8x32xf32> to vector<8x32xf32>
    %c0_6 = arith.constant 0 : index
    %c0_7 = arith.constant 0 : index
    %c0_8 = arith.constant 0 : index
    %7 = vector.load %arg4[%c0_6, %c0_7, %c0_8] : memref<1x1x8xf32, #tpu.memory_space<vmem>>, vector<1x1x8xf32>
    %8 = vector.shape_cast %7 : vector<1x1x8xf32> to vector<1x8xf32>
    %9 = arith.addf %4, %6 : vector<8x32xf32>
    %10 = arith.truncf %9 : vector<8x32xf32> to vector<8x32xbf16>
    %c0_9 = arith.constant 0 : index
    %c0_10 = arith.constant 0 : index
    %c0_11 = arith.constant 0 : index
    %11 = vector.load %arg5[%c0_9, %c0_10, %c0_11] : memref<1x32x64xbf16, #tpu.memory_space<vmem>>, vector<1x32x64xbf16>
    %12 = vector.shape_cast %11 : vector<1x32x64xbf16> to vector<32x64xbf16>
    %cst = arith.constant dense<0.000000e+00> : vector<8x64xf32>
    %13 = tpu.matmul %10, %12, %cst {dimension_numbers = #tpu.dot_dimension_numbers<[1], [0], [0], [1], [0, 0, 1, 1], [], []>} : vector<8x32xbf16>, vector<32x64xbf16>, vector<8x64xf32> -> vector<8x64xf32>
    %c0_12 = arith.constant 0 : index
    %c0_13 = arith.constant 0 : index
    %c0_14 = arith.constant 0 : index
    %14 = vector.load %arg6[%c0_12, %c0_13, %c0_14] : memref<1x1x64xf32, #tpu.memory_space<vmem>>, vector<1x1x64xf32>
    %15 = vector.shape_cast %14 : vector<1x1x64xf32> to vector<1x64xf32>
    %16 = vector.broadcast %15 : vector<1x64xf32> to vector<8x64xf32>
    %17 = arith.addf %13, %16 : vector<8x64xf32>
    %18 = arith.truncf %4 : vector<8x32xf32> to vector<8x32xbf16>
    %c0_15 = arith.constant 0 : index
    %c0_16 = arith.constant 0 : index
    %c0_17 = arith.constant 0 : index
    %19 = vector.load %arg7[%c0_15, %c0_16, %c0_17] : memref<1x32x32xbf16, #tpu.memory_space<vmem>>, vector<1x32x32xbf16>
    %20 = vector.shape_cast %19 : vector<1x32x32xbf16> to vector<32x32xbf16>
    %cst_18 = arith.constant dense<0.000000e+00> : vector<8x32xf32>
    %21 = tpu.matmul %18, %20, %cst_18 {dimension_numbers = #tpu.dot_dimension_numbers<[1], [0], [0], [1], [0, 0, 1, 1], [], []>} : vector<8x32xbf16>, vector<32x32xbf16>, vector<8x32xf32> -> vector<8x32xf32>
    %c0_19 = arith.constant 0 : index
    %c0_20 = arith.constant 0 : index
    %c0_21 = arith.constant 0 : index
    %22 = vector.load %arg8[%c0_19, %c0_20, %c0_21] : memref<1x1x32xf32, #tpu.memory_space<vmem>>, vector<1x1x32xf32>
    %23 = vector.shape_cast %22 : vector<1x1x32xf32> to vector<1x32xf32>
    %24 = vector.broadcast %23 : vector<1x32xf32> to vector<8x32xf32>
    %25 = arith.addf %21, %24 : vector<8x32xf32>
    %26 = tpu.transpose %17, [1, 0] : vector<8x64xf32> -> vector<64x8xf32>
    %27 = tpu.transpose %25, [1, 0] : vector<8x32xf32> -> vector<32x8xf32>
    %28 = vector.extract_strided_slice %26 {offsets = [0, 0], sizes = [8, 8], strides = [1, 1]} : vector<64x8xf32> to vector<8x8xf32>
    %29 = vector.extract_strided_slice %26 {offsets = [8, 0], sizes = [8, 8], strides = [1, 1]} : vector<64x8xf32> to vector<8x8xf32>
    %30 = vector.extract_strided_slice %26 {offsets = [16, 0], sizes = [8, 8], strides = [1, 1]} : vector<64x8xf32> to vector<8x8xf32>
    %31 = vector.extract_strided_slice %26 {offsets = [24, 0], sizes = [8, 8], strides = [1, 1]} : vector<64x8xf32> to vector<8x8xf32>
    %32 = vector.shape_cast %28 : vector<8x8xf32> to vector<1x8x8xf32>
    %33 = vector.shape_cast %29 : vector<8x8xf32> to vector<1x8x8xf32>
    %34 = vector.shape_cast %30 : vector<8x8xf32> to vector<1x8x8xf32>
    %35 = vector.shape_cast %31 : vector<8x8xf32> to vector<1x8x8xf32>
    %36 = tpu.concatenate %32, %33, %34, %35 in 0 : vector<1x8x8xf32>, vector<1x8x8xf32>, vector<1x8x8xf32>, vector<1x8x8xf32> -> vector<4x8x8xf32>
    %37 = vector.extract_strided_slice %26 {offsets = [32, 0], sizes = [8, 8], strides = [1, 1]} : vector<64x8xf32> to vector<8x8xf32>
    %38 = vector.extract_strided_slice %26 {offsets = [40, 0], sizes = [8, 8], strides = [1, 1]} : vector<64x8xf32> to vector<8x8xf32>
    %39 = vector.extract_strided_slice %26 {offsets = [48, 0], sizes = [8, 8], strides = [1, 1]} : vector<64x8xf32> to vector<8x8xf32>
    %40 = vector.extract_strided_slice %26 {offsets = [56, 0], sizes = [8, 8], strides = [1, 1]} : vector<64x8xf32> to vector<8x8xf32>
    %41 = vector.shape_cast %37 : vector<8x8xf32> to vector<1x8x8xf32>
    %42 = vector.shape_cast %38 : vector<8x8xf32> to vector<1x8x8xf32>
    %43 = vector.shape_cast %39 : vector<8x8xf32> to vector<1x8x8xf32>
    %44 = vector.shape_cast %40 : vector<8x8xf32> to vector<1x8x8xf32>
    %45 = tpu.concatenate %41, %42, %43, %44 in 0 : vector<1x8x8xf32>, vector<1x8x8xf32>, vector<1x8x8xf32>, vector<1x8x8xf32> -> vector<4x8x8xf32>
    %46 = vector.extract_strided_slice %27 {offsets = [0, 0], sizes = [8, 8], strides = [1, 1]} : vector<32x8xf32> to vector<8x8xf32>
    %47 = vector.extract_strided_slice %27 {offsets = [8, 0], sizes = [8, 8], strides = [1, 1]} : vector<32x8xf32> to vector<8x8xf32>
    %48 = vector.extract_strided_slice %27 {offsets = [16, 0], sizes = [8, 8], strides = [1, 1]} : vector<32x8xf32> to vector<8x8xf32>
    %49 = vector.extract_strided_slice %27 {offsets = [24, 0], sizes = [8, 8], strides = [1, 1]} : vector<32x8xf32> to vector<8x8xf32>
    %50 = vector.shape_cast %46 : vector<8x8xf32> to vector<1x8x8xf32>
    %51 = vector.shape_cast %47 : vector<8x8xf32> to vector<1x8x8xf32>
    %52 = vector.shape_cast %48 : vector<8x8xf32> to vector<1x8x8xf32>
    %53 = vector.shape_cast %49 : vector<8x8xf32> to vector<1x8x8xf32>
    %54 = tpu.concatenate %50, %51, %52, %53 in 0 : vector<1x8x8xf32>, vector<1x8x8xf32>, vector<1x8x8xf32>, vector<1x8x8xf32> -> vector<4x8x8xf32>
    %cst_22 = arith.constant dense<0.000000e+00> : vector<4x8x8xf32>
    %55 = tpu.matmul %36, %45, %cst_22 {dimension_numbers = #tpu.dot_dimension_numbers<[1], [1], [2], [2], [0, 0, 0, 2, 1, 2], [0], [0]>} : vector<4x8x8xf32>, vector<4x8x8xf32>, vector<4x8x8xf32> -> vector<4x8x8xf32>
    %56 = vector.shape_cast %8 : vector<1x8xf32> to vector<1x1x8xf32>
    %57 = vector.broadcast %56 : vector<1x1x8xf32> to vector<4x8x8xf32>
    %58 = arith.addf %55, %57 : vector<4x8x8xf32>
    %cst_23 = arith.constant dense<0xFF800000> : vector<4x8xf32>
    %59 = vector.multi_reduction <maximumf>, %58, %cst_23 [2] : vector<4x8x8xf32> to vector<4x8xf32>
    %60 = vector.shape_cast %59 : vector<4x8xf32> to vector<4x8x1xf32>
    %61 = vector.broadcast %60 : vector<4x8x1xf32> to vector<4x8x8xf32>
    %62 = arith.subf %58, %61 : vector<4x8x8xf32>
    %63 = math.exp %62 : vector<4x8x8xf32>
    %cst_24 = arith.constant dense<0.000000e+00> : vector<4x8xf32>
    %64 = vector.multi_reduction <add>, %63, %cst_24 [2] : vector<4x8x8xf32> to vector<4x8xf32>
    %65 = vector.shape_cast %64 : vector<4x8xf32> to vector<4x8x1xf32>
    %66 = vector.broadcast %65 : vector<4x8x1xf32> to vector<4x8x8xf32>
    %67 = arith.divf %63, %66 : vector<4x8x8xf32>
    %cst_25 = arith.constant dense<0.000000e+00> : vector<8x8xf32>
    %68 = vector.multi_reduction <add>, %67, %cst_25 [0] : vector<4x8x8xf32> to vector<8x8xf32>
    %cst_26 = arith.constant 4.000000e+00 : f32
    %69 = vector.broadcast %cst_26 : f32 to vector<8x8xf32>
    %70 = arith.divf %68, %69 : vector<8x8xf32>
    %c0_27 = arith.constant 0 : index
    %c0_28 = arith.constant 0 : index
    %c0_29 = arith.constant 0 : index
    %c0_30 = arith.constant 0 : index
    %71 = vector.load %arg18[%c0_27, %c0_28, %c0_29, %c0_30] : memref<1x1x8x8xf32, #tpu.memory_space<vmem>>, vector<1x1x8x8xf32>
    %72 = vector.shape_cast %71 : vector<1x1x8x8xf32> to vector<8x8xf32>
    %73 = vector.shape_cast %70 : vector<8x8xf32> to vector<1x1x8x8xf32>
    tpu.vector_store %arg18[%c0_27, %c0_28, %c0_29, %c0_30], %73 {strides = array<i32>} : memref<1x1x8x8xf32, #tpu.memory_space<vmem>>, vector<1x1x8x8xf32>,
    %cst_31 = arith.constant dense<0.000000e+00> : vector<4x8x8xf32>
    %74 = tpu.matmul %54, %67, %cst_31 {dimension_numbers = #tpu.dot_dimension_numbers<[2], [2], [1], [1], [0, 0, 0, 1, 1, 1], [0], [0]>} : vector<4x8x8xf32>, vector<4x8x8xf32>, vector<4x8x8xf32> -> vector<4x8x8xf32>
    %75 = vector.extract_strided_slice %74 {offsets = [0, 0, 0], sizes = [1, 8, 8], strides = [1, 1, 1]} : vector<4x8x8xf32> to vector<1x8x8xf32>
    %76 = vector.shape_cast %75 : vector<1x8x8xf32> to vector<8x8xf32>
    %77 = vector.extract_strided_slice %74 {offsets = [1, 0, 0], sizes = [1, 8, 8], strides = [1, 1, 1]} : vector<4x8x8xf32> to vector<1x8x8xf32>
    %78 = vector.shape_cast %77 : vector<1x8x8xf32> to vector<8x8xf32>
    %79 = vector.extract_strided_slice %74 {offsets = [2, 0, 0], sizes = [1, 8, 8], strides = [1, 1, 1]} : vector<4x8x8xf32> to vector<1x8x8xf32>
    %80 = vector.shape_cast %79 : vector<1x8x8xf32> to vector<8x8xf32>
    %81 = vector.extract_strided_slice %74 {offsets = [3, 0, 0], sizes = [1, 8, 8], strides = [1, 1, 1]} : vector<4x8x8xf32> to vector<1x8x8xf32>
    %82 = vector.shape_cast %81 : vector<1x8x8xf32> to vector<8x8xf32>
    %83 = tpu.concatenate %76, %78, %80, %82 in 0 : vector<8x8xf32>, vector<8x8xf32>, vector<8x8xf32>, vector<8x8xf32> -> vector<32x8xf32>
    %84 = tpu.transpose %83, [1, 0] : vector<32x8xf32> -> vector<8x32xf32>
    %85 = arith.truncf %84 : vector<8x32xf32> to vector<8x32xbf16>
    %c0_32 = arith.constant 0 : index
    %c0_33 = arith.constant 0 : index
    %c0_34 = arith.constant 0 : index
    %86 = vector.load %arg9[%c0_32, %c0_33, %c0_34] : memref<1x32x32xbf16, #tpu.memory_space<vmem>>, vector<1x32x32xbf16>
    %87 = vector.shape_cast %86 : vector<1x32x32xbf16> to vector<32x32xbf16>
    %cst_35 = arith.constant dense<0.000000e+00> : vector<8x32xf32>
    %88 = tpu.matmul %85, %87, %cst_35 {dimension_numbers = #tpu.dot_dimension_numbers<[1], [0], [0], [1], [0, 0, 1, 1], [], []>} : vector<8x32xbf16>, vector<32x32xbf16>, vector<8x32xf32> -> vector<8x32xf32>
    %c0_36 = arith.constant 0 : index
    %c0_37 = arith.constant 0 : index
    %c0_38 = arith.constant 0 : index
    %89 = vector.load %arg10[%c0_36, %c0_37, %c0_38] : memref<1x1x32xf32, #tpu.memory_space<vmem>>, vector<1x1x32xf32>
    %90 = vector.shape_cast %89 : vector<1x1x32xf32> to vector<1x32xf32>
    %91 = vector.broadcast %90 : vector<1x32xf32> to vector<8x32xf32>
    %92 = arith.addf %88, %91 : vector<8x32xf32>
    %93 = arith.addf %4, %92 : vector<8x32xf32>
    %c0_39 = arith.constant 0 : index
    %c0_40 = arith.constant 0 : index
    %c0_41 = arith.constant 0 : index
    %94 = vector.load %arg11[%c0_39, %c0_40, %c0_41] : memref<1x1x32xf32, #tpu.memory_space<vmem>>, vector<1x1x32xf32>
    %95 = vector.shape_cast %94 : vector<1x1x32xf32> to vector<1x32xf32>
    %c0_42 = arith.constant 0 : index
    %c0_43 = arith.constant 0 : index
    %c0_44 = arith.constant 0 : index
    %96 = vector.load %arg12[%c0_42, %c0_43, %c0_44] : memref<1x1x32xf32, #tpu.memory_space<vmem>>, vector<1x1x32xf32>
    %97 = vector.shape_cast %96 : vector<1x1x32xf32> to vector<1x32xf32>
    %cst_45 = arith.constant dense<0.000000e+00> : vector<8xf32>
    %98 = vector.multi_reduction <add>, %93, %cst_45 [1] : vector<8x32xf32> to vector<8xf32>
    %99 = vector.shape_cast %98 : vector<8xf32> to vector<8x1xf32>
    %cst_46 = arith.constant 3.200000e+01 : f32
    %100 = vector.broadcast %cst_46 : f32 to vector<8x1xf32>
    %101 = arith.divf %99, %100 : vector<8x1xf32>
    %102 = vector.broadcast %101 : vector<8x1xf32> to vector<8x32xf32>
    %103 = arith.subf %93, %102 : vector<8x32xf32>
    %104 = arith.mulf %103, %103 : vector<8x32xf32>
    %cst_47 = arith.constant dense<0.000000e+00> : vector<8xf32>
    %105 = vector.multi_reduction <add>, %104, %cst_47 [1] : vector<8x32xf32> to vector<8xf32>
    %106 = vector.shape_cast %105 : vector<8xf32> to vector<8x1xf32>
    %cst_48 = arith.constant 3.200000e+01 : f32
    %107 = vector.broadcast %cst_48 : f32 to vector<8x1xf32>
    %108 = arith.divf %106, %107 : vector<8x1xf32>
    %109 = vector.broadcast %101 : vector<8x1xf32> to vector<8x32xf32>
    %110 = arith.subf %93, %109 : vector<8x32xf32>
    %cst_49 = arith.constant 9.99999974E-6 : f32
    %111 = vector.broadcast %cst_49 : f32 to vector<8x1xf32>
    %112 = arith.addf %108, %111 : vector<8x1xf32>
    %113 = math.rsqrt %112 : vector<8x1xf32>
    %114 = vector.broadcast %113 : vector<8x1xf32> to vector<8x32xf32>
    %115 = arith.mulf %110, %114 : vector<8x32xf32>
    %116 = vector.broadcast %95 : vector<1x32xf32> to vector<8x32xf32>
    %117 = arith.mulf %115, %116 : vector<8x32xf32>
    %118 = vector.broadcast %97 : vector<1x32xf32> to vector<8x32xf32>
    %119 = arith.addf %117, %118 : vector<8x32xf32>
    %120 = arith.truncf %119 : vector<8x32xf32> to vector<8x32xbf16>
    %c0_50 = arith.constant 0 : index
    %c0_51 = arith.constant 0 : index
    %c0_52 = arith.constant 0 : index
    %121 = vector.load %arg13[%c0_50, %c0_51, %c0_52] : memref<1x32x64xbf16, #tpu.memory_space<vmem>>, vector<1x32x64xbf16>
    %122 = vector.shape_cast %121 : vector<1x32x64xbf16> to vector<32x64xbf16>
    %cst_53 = arith.constant dense<0.000000e+00> : vector<8x64xf32>
    %123 = tpu.matmul %120, %122, %cst_53 {dimension_numbers = #tpu.dot_dimension_numbers<[1], [0], [0], [1], [0, 0, 1, 1], [], []>} : vector<8x32xbf16>, vector<32x64xbf16>, vector<8x64xf32> -> vector<8x64xf32>
    %c0_54 = arith.constant 0 : index
    %c0_55 = arith.constant 0 : index
    %c0_56 = arith.constant 0 : index
    %124 = vector.load %arg14[%c0_54, %c0_55, %c0_56] : memref<1x1x64xf32, #tpu.memory_space<vmem>>, vector<1x1x64xf32>
    %125 = vector.shape_cast %124 : vector<1x1x64xf32> to vector<1x64xf32>
    %126 = vector.broadcast %125 : vector<1x64xf32> to vector<8x64xf32>
    %127 = arith.addf %123, %126 : vector<8x64xf32>
    %cst_57 = arith.constant 0.000000e+00 : f32
    %128 = vector.broadcast %cst_57 : f32 to vector<8x64xf32>
    %129 = arith.maximumf %127, %128 : vector<8x64xf32>
    %130 = arith.truncf %129 : vector<8x64xf32> to vector<8x64xbf16>
    %c0_58 = arith.constant 0 : index
    %c0_59 = arith.constant 0 : index
    %c0_60 = arith.constant 0 : index
    %131 = vector.load %arg15[%c0_58, %c0_59, %c0_60] : memref<1x64x32xbf16, #tpu.memory_space<vmem>>, vector<1x64x32xbf16>
    %132 = vector.shape_cast %131 : vector<1x64x32xbf16> to vector<64x32xbf16>
    %cst_61 = arith.constant dense<0.000000e+00> : vector<8x32xf32>
    %133 = tpu.matmul %130, %132, %cst_61 {dimension_numbers = #tpu.dot_dimension_numbers<[1], [0], [0], [1], [0, 0, 1, 1], [], []>} : vector<8x64xbf16>, vector<64x32xbf16>, vector<8x32xf32> -> vector<8x32xf32>
    %c0_62 = arith.constant 0 : index
    %c0_63 = arith.constant 0 : index
    %c0_64 = arith.constant 0 : index
    %134 = vector.load %arg16[%c0_62, %c0_63, %c0_64] : memref<1x1x32xf32, #tpu.memory_space<vmem>>, vector<1x1x32xf32>
    %135 = vector.shape_cast %134 : vector<1x1x32xf32> to vector<1x32xf32>
    %136 = vector.broadcast %135 : vector<1x32xf32> to vector<8x32xf32>
    %137 = arith.addf %133, %136 : vector<8x32xf32>
    %138 = arith.addf %119, %137 : vector<8x32xf32>
    %c0_65 = arith.constant 0 : index
    %c0_66 = arith.constant 0 : index
    %c0_67 = arith.constant 0 : index
    %139 = vector.load %arg17[%c0_65, %c0_66, %c0_67] : memref<1x8x32xf32, #tpu.memory_space<vmem>>, vector<1x8x32xf32>
    %140 = vector.shape_cast %139 : vector<1x8x32xf32> to vector<8x32xf32>
    %141 = vector.shape_cast %138 : vector<8x32xf32> to vector<1x8x32xf32>
    tpu.vector_store %arg17[%c0_65, %c0_66, %c0_67], %141 {strides = array<i32>} : memref<1x8x32xf32, #tpu.memory_space<vmem>>, vector<1x8x32xf32>,
    return
  }
  func.func @transform_0(%arg0: i32, %arg1: i32) -> (i32, i32, i32) {
    %c0_i32 = arith.constant 0 : i32
    %c0_i32_0 = arith.constant 0 : i32
    %c0_i32_1 = arith.constant 0 : i32
    return %arg0, %c0_i32, %c0_i32_0 : i32, i32, i32
  }
  func.func @transform_1(%arg0: i32, %arg1: i32) -> (i32, i32, i32) {
    %c0_i32 = arith.constant 0 : i32
    %c0_i32_0 = arith.constant 0 : i32
    %c0_i32_1 = arith.constant 0 : i32
    return %arg0, %c0_i32, %c0_i32_0 : i32, i32, i32
  }
  func.func @transform_2(%arg0: i32, %arg1: i32) -> (i32, i32, i32) {
    %c0_i32 = arith.constant 0 : i32
    %c0_i32_0 = arith.constant 0 : i32
    %c0_i32_1 = arith.constant 0 : i32
    return %arg0, %c0_i32, %c0_i32_0 : i32, i32, i32
  }
  func.func @transform_3(%arg0: i32, %arg1: i32) -> (i32, i32, i32) {
    %c0_i32 = arith.constant 0 : i32
    %c0_i32_0 = arith.constant 0 : i32
    %c0_i32_1 = arith.constant 0 : i32
    return %arg1, %c0_i32, %c0_i32_0 : i32, i32, i32
  }
  func.func @transform_4(%arg0: i32, %arg1: i32) -> (i32, i32, i32) {
    %c0_i32 = arith.constant 0 : i32
    %c0_i32_0 = arith.constant 0 : i32
    %c0_i32_1 = arith.constant 0 : i32
    return %arg1, %c0_i32, %c0_i32_0 : i32, i32, i32
  }
  func.func @transform_5(%arg0: i32, %arg1: i32) -> (i32, i32, i32) {
    %c0_i32 = arith.constant 0 : i32
    %c0_i32_0 = arith.constant 0 : i32
    %c0_i32_1 = arith.constant 0 : i32
    return %arg1, %c0_i32, %c0_i32_0 : i32, i32, i32
  }
  func.func @transform_6(%arg0: i32, %arg1: i32) -> (i32, i32, i32) {
    %c0_i32 = arith.constant 0 : i32
    %c0_i32_0 = arith.constant 0 : i32
    %c0_i32_1 = arith.constant 0 : i32
    return %arg1, %c0_i32, %c0_i32_0 : i32, i32, i32
  }
  func.func @transform_7(%arg0: i32, %arg1: i32) -> (i32, i32, i32) {
    %c0_i32 = arith.constant 0 : i32
    %c0_i32_0 = arith.constant 0 : i32
    %c0_i32_1 = arith.constant 0 : i32
    return %arg1, %c0_i32, %c0_i32_0 : i32, i32, i32
  }
  func.func @transform_8(%arg0: i32, %arg1: i32) -> (i32, i32, i32) {
    %c0_i32 = arith.constant 0 : i32
    %c0_i32_0 = arith.constant 0 : i32
    %c0_i32_1 = arith.constant 0 : i32
    return %arg1, %c0_i32, %c0_i32_0 : i32, i32, i32
  }
  func.func @transform_9(%arg0: i32, %arg1: i32) -> (i32, i32, i32) {
    %c0_i32 = arith.constant 0 : i32
    %c0_i32_0 = arith.constant 0 : i32
    %c0_i32_1 = arith.constant 0 : i32
    return %arg1, %c0_i32, %c0_i32_0 : i32, i32, i32
  }
  func.func @transform_10(%arg0: i32, %arg1: i32) -> (i32, i32, i32) {
    %c0_i32 = arith.constant 0 : i32
    %c0_i32_0 = arith.constant 0 : i32
    %c0_i32_1 = arith.constant 0 : i32
    return %arg1, %c0_i32, %c0_i32_0 : i32, i32, i32
  }
  func.func @transform_11(%arg0: i32, %arg1: i32) -> (i32, i32, i32) {
    %c0_i32 = arith.constant 0 : i32
    %c0_i32_0 = arith.constant 0 : i32
    %c0_i32_1 = arith.constant 0 : i32
    return %arg1, %c0_i32, %c0_i32_0 : i32, i32, i32
  }
  func.func @transform_12(%arg0: i32, %arg1: i32) -> (i32, i32, i32) {
    %c0_i32 = arith.constant 0 : i32
    %c0_i32_0 = arith.constant 0 : i32
    %c0_i32_1 = arith.constant 0 : i32
    return %arg1, %c0_i32, %c0_i32_0 : i32, i32, i32
  }
  func.func @transform_13(%arg0: i32, %arg1: i32) -> (i32, i32, i32) {
    %c0_i32 = arith.constant 0 : i32
    %c0_i32_0 = arith.constant 0 : i32
    %c0_i32_1 = arith.constant 0 : i32
    return %arg1, %c0_i32, %c0_i32_0 : i32, i32, i32
  }
  func.func @transform_14(%arg0: i32, %arg1: i32) -> (i32, i32, i32) {
    %c0_i32 = arith.constant 0 : i32
    %c0_i32_0 = arith.constant 0 : i32
    %c0_i32_1 = arith.constant 0 : i32
    return %arg1, %c0_i32, %c0_i32_0 : i32, i32, i32
  }
  func.func @transform_15(%arg0: i32, %arg1: i32) -> (i32, i32, i32) {
    %c0_i32 = arith.constant 0 : i32
    %c0_i32_0 = arith.constant 0 : i32
    %c0_i32_1 = arith.constant 0 : i32
    return %arg0, %c0_i32, %c0_i32_0 : i32, i32, i32
  }
  func.func @transform_16(%arg0: i32, %arg1: i32) -> (i32, i32, i32, i32) {
    %c0_i32 = arith.constant 0 : i32
    %c0_i32_0 = arith.constant 0 : i32
    %c0_i32_1 = arith.constant 0 : i32
    return %arg1, %arg0, %c0_i32, %c0_i32_0 : i32, i32, i32, i32
  }
}

</mosaic_0001>

<bundles_post_ra>
// kernel: tpu_custom_call.1
= control target key start
LH: loop header
LB: loop body
LE: loop exit
PB: predicated region body
PF: predicated region fallthrough
CT: control target
= control target key end

     0   :  { %s3819_s0 = inlined_call_operand.hbm [shape: f32[2,8,32], index: 0, kind: input, shape index: {}]   ;;  %s3820_s1 = inlined_call_operand.hbm [shape: f32[2,8,32], index: 1, kind: input, shape index: {}]   ;;  %s3821_s2 = inlined_call_operand.vmem [shape: f32[2,1,8], index: 2, kind: input, shape index: {}]   ;;  %s3822_s3 = inlined_call_operand.vmem [shape: bf16[2,32,64], index: 3, kind: input, shape index: {}]   ;;  %s3823_s4 = inlined_call_operand.vmem [shape: f32[2,1,64], index: 4, kind: input, shape index: {}]   ;;  %s3824_s5 = inlined_call_operand.vmem [shape: bf16[2,32,32], index: 5, kind: input, shape index: {}]   ;;  %s3825_s6 = inlined_call_operand.vmem [shape: f32[2,1,32], index: 6, kind: input, shape index: {}]   ;;  %s3826_s7 = inlined_call_operand.vmem [shape: bf16[2,32,32], index: 7, kind: input, shape index: {}]   ;;  %s3827_s8 = inlined_call_operand.vmem [shape: f32[2,1,32], index: 8, kind: input, shape index: {}]   ;;  %s3828_s9 = inlined_call_operand.vmem [shape: f32[2,1,32], index: 9, kind: input, shape index: {}]   ;;  %s3829_s10 = inlined_call_operand.vmem [shape: f32[2,1,32], index: 10, kind: input, shape index: {}]   ;;  %s3830_s11 = inlined_call_operand.hbm [shape: bf16[2,32,64], index: 11, kind: input, shape index: {}]   ;;  %s3831_s12 = inlined_call_operand.vmem [shape: f32[2,1,64], index: 12, kind: input, shape index: {}]   ;;  %s3832_s13 = inlined_call_operand.vmem [shape: bf16[2,64,32], index: 13, kind: input, shape index: {}]   ;;  %s3833_s14 = inlined_call_operand.vmem [shape: f32[2,1,32], index: 14, kind: input, shape index: {}]   ;;  %s3834_s15 = inlined_call_operand.hbm [shape: f32[2,8,32], index: 15, kind: output, shape index: {0}]   ;;  %s3835_s16 = inlined_call_operand.hbm [shape: f32[2,2,8,8], index: 16, kind: output, shape index: {1}]  }
   0x1   :  { %3870 = sst [smem:[#allocation38_spill]] %s3819_s0 }
   0x2   :  { %3871 = sst [smem:[#allocation39_spill]] %s3820_s1 }
   0x3   :  { %3872 = sst [smem:[#allocation40_spill]] %s3821_s2 }
   0x4   :  { %3873 = sst [smem:[#allocation41_spill]] %s3822_s3 }
   0x5   :  { %3874 = sst [smem:[#allocation42_spill]] %s3823_s4 }
   0x6   :  { %3875 = sst [smem:[#allocation43_spill]] %s3824_s5 }
   0x7   :  { %3876 = sst [smem:[#allocation44_spill]] %s3825_s6 }
   0x8   :  { %3877 = sst [smem:[#allocation45_spill]] %s3826_s7 }
   0x9   :  { %3878 = sst [smem:[#allocation46_spill]] %s3827_s8 }
   0xa   :  { %3879 = sst [smem:[#allocation47_spill]] %s3828_s9 }
   0xb   :  { %3880 = sst [smem:[#allocation48_spill]] %s3829_s10 }
   0xc   :  { %3881 = sst [smem:[#allocation49_spill]] %s3830_s11 }
   0xd   :  { %3882 = sst [smem:[#allocation50_spill]] %s3831_s12 }
   0xe   :  { %3883 = sst [smem:[#allocation51_spill]] %s3832_s13 }
   0xf   :  { %3884 = sst [smem:[#allocation52_spill]] %s3833_s14 }
  0x10   :  { %3885 = sst [smem:[#allocation53_spill]] %s3834_s15 }
  0x11   :  { %3886 = sst [smem:[#allocation54_spill]] %s3835_s16 }
  0x12   :  { %22 = vsyncpa [#allocation3], 0 }
  0x13   :  { %24 = vsyncpa [#allocation3 + $0x1], 0 }
  0x14   :  { %25 = vsyncpa [#allocation6], 0 }
  0x15   :  { %27 = vsyncpa [#allocation6 + $0x1], 0 }
  0x16   :  { %28 = vsyncpa [#allocation4], 0 }
  0x17   :  { %30 = vsyncpa [#allocation4 + $0x1], 0 }
  0x18   :  { %31 = vsyncpa [#allocation10], 0 }
  0x19   :  { %33 = vsyncpa [#allocation10 + $0x1], 0  ;;  %s3159_s21 = smov 0   ;;  %s3161_s22 = smov 0  }
  0x1a   :  { %s3163_s23 = smov 0   ;;  %s3165_s24 = smov 0  }
  0x1b   :  { %s3167_s25 = smov 0   ;;  %s3169_s26 = smov 0  }
  0x1c   :  { %s3171_s27 = smov 0   ;;  %s3173_s28 = smov 0  }
  0x1d   :  { %s3175_s29 = smov 0   ;;  %s3177_s30 = smov 0  }
  0x1e   :  { %s3179_s0 = smov 0   ;;  %s3181_s17 = smov 0  }
  0x1f   :  { %s3183_s18 = smov 0   ;;  %s3185_s19 = smov 0  }
  0x20 LB: > { %3887 = sst [smem:[#allocation16_spill]] %s3011_s21  ;;  %s3230_s20 = sadd.s32 4294967295, %s3063_s19   ;;  %s3063_s19 = sphi %s3185_s19, %s39_s19   ;;  %s3059_s18 = sphi %s3183_s18, %s3989_s18   ;;  %s3055_s17 = sphi %s3181_s17, %s3988_s17   ;;  %s3051_s0 = sphi %s3179_s0, %s3987_s0   ;;  %s3047_s30 = sphi %s3177_s30, %s3986_s30   ;;  %s3043_s29 = sphi %s3175_s29, %s3985_s29   ;;  %s3039_s28 = sphi %s3173_s28, %s3984_s28   ;;  %s3035_s27 = sphi %s3171_s27, %s3983_s27   ;;  %s3031_s26 = sphi %s3169_s26, %s3982_s26   ;;  %s3027_s25 = sphi %s3167_s25, %s3981_s25   ;;  %s3023_s24 = sphi %s3165_s24, %s3980_s24   ;;  %s3019_s23 = sphi %s3163_s23, %s3979_s23   ;;  %s3015_s22 = sphi %s3161_s22, %s3978_s22   ;;  %s3011_s21 = sphi %s3159_s21, %s3977_s21  }
  0x21   : > { %3888 = sst [smem:[#allocation17_spill]] %s3015_s22  ;;  %s2421_s15 = sadd.s32 4294967294, %s3063_s19  }
  0x22   : > { %3889 = sst [smem:[#allocation18_spill]] %s3019_s23  ;;  %s48_s16 = sadd.s32 1, %s3055_s17 }
  0x23   : > { %3890 = sst [smem:[#allocation19_spill]] %s3027_s25  ;;  %s51_s13 = sadd.s32 1, %s3059_s18 }
  0x24   : > { %3891 = sst [smem:[#allocation20_spill]] %s3031_s26  ;;  %p49_p0 = scmp.ge.s32.totalorder %s48_s16, 2 }
  0x25   : > { %3892 = sst [smem:[#allocation21_spill]] %s3035_s27  ;;  %s58_s14 = sadd.s32 1, %s3043_s29 }
  0x26   : > { %3893 = sst [smem:[#allocation22_spill]] %s3039_s28  ;;  %p65_p1 = scmp.ne.s32.totalorder %s3043_s29, %s3039_s28 }
  0x27   : > { %3894 = sst [smem:[#allocation23_spill]] %s3043_s29  ;;  %p66_p2 = scmp.eq.s32.totalorder %s3063_s19, 0 }
  0x28   : > { %3895 = sst [smem:[#allocation24_spill]] %s3051_s0  ;;  %s3991_s16 = smov (%p49_p0, %s48_s16), 0 }
  0x29   : > { %3896 = sst [smem:[#allocation25_spill]] %s3055_s17  ;;  %s3993_s13 = smov (!%p49_p0, %s51_s13), %s3059_s18 }
  0x2a   : > { %3897 = sst [smem:[#allocation26_spill]] %s3059_s18  ;;  %p3247_p3 = por %p66_p2, %p65_p1 }
  0x2b   : > { %3898 = sst [smem:[#allocation27_spill]] %s3063_s19  ;;  %p71_p4 = scmp.ne.s32.totalorder %s3039_s28, %s3035_s27 }
  0x2c   : > { %3899 = sst [smem:[#allocation28_spill]] %s3991_s16  ;;  %p53_p5 = scmp.ge.s32.totalorder %s3993_s13, 2 }
  0x2d   : > { %p72_p6 = scmp.eq.s32.totalorder %s3230_s20, 0  ;;  %s341_s10 = ssub.s32 %s3055_s17, %s3991_s16 }
  0x2e   : > { %s344_s9 = sadd.s32 1, %s3031_s26  ;;  %s3995_s13 = smov (%p53_p5, %s3993_s13), 0 }
  0x2f   : > { %3901 = sst [smem:[#allocation29_spill]] %s3995_s13  ;;  %p3264_p7 = por %p72_p6, %p71_p4 }
  0x30   : > { %p342_p8 = scmp.eq.s32.totalorder %s341_s10, 0  ;;  %s55_s7 = ssub.s32 %s3059_s18, %s3995_s13 }
  0x31   : > { %s3902_s8 = scalar_select %p3264_p7, 1, 0 }
  0x32   : > { %p351_p9 = scmp.ne.s32.totalorder %s3031_s26, %s3027_s25  ;;  %p56_p10 = scmp.eq.s32.totalorder %s55_s7, 0 }
  0x33   : > { %p357_p11 = scmp.ne.s32.totalorder %s3027_s25, %s3023_s24  ;;  %p459_p0 = scmp.eq.s32.totalorder %s3230_s20, 3 }
  0x34   : > { %s3275_s16 = scalar_select %p342_p8, %s3031_s26, %s344_s9  }
  0x35   : > { %s3278_s6 = scalar_select %p56_p10, %s3043_s29, %s58_s14  }
  0x36   : > { %3903 = sst [smem:[#allocation30_spill]] %s3275_s16  ;;  %p3282_p12 = por %p351_p9, %p66_p2 }
  0x37   : > { %3904 = sst [smem:[#allocation31_spill]] %s3278_s6  ;;  %p3288_p13 = por %p357_p11, %p72_p6 }
  0x38   : > { %p465_p5 = scmp.eq.s32.totalorder %s2421_s15, 3  ;;  %s473_s9 = sor.u32 %s341_s10, %s55_s7 }
  0x39   : > { %s3906_s13 = scalar_select %p3288_p13, 1, 0 }
  0x3a   : > { %s476_s14 = sadd.s32 1, %s3019_s23  ;;  %p3297_p8 = por %p459_p0, %p65_p1 }
  0x3b   : > { %p3304_p2 = por %p465_p5, %p71_p4  ;;  %p474_p6 = scmp.eq.s32.totalorder %s473_s9, 0 }
  0x3c   : > { %s3907_s24 = scalar_select %p3297_p8, 1, 0 }
  0x3d   : > { %s3909_s6 = scalar_select %p3304_p2, 1, 0 }
  0x3e   : > { %3908 = sst [smem:[#allocation32_spill]] %s3907_s24  ;;  %p486_p9 = scmp.ne.s32.totalorder %s3019_s23, %s3015_s22 }
  0x3f   : > { %3910 = sst [smem:[#allocation33_spill]] %s3909_s6  ;;  %p492_p10 = scmp.ne.s32.totalorder %s3015_s22, %s3011_s21 }
  0x40   : > { %s3313_s15 = scalar_select %p474_p6, %s3019_s23, %s476_s14  }
  0x41   : > { %p3315_p11 = por %p486_p9, %p459_p0  ;;  %p3319_p1 = por %p492_p10, %p465_p5 }
  0x42   : > { %3911 = sst [smem:[#allocation34_spill]] %s3313_s15  ;;  %p2639_p8 = scmp.lt.s32.totalorder %s3063_s19, 4 }
  0x43   : > { %s3912_s7 = scalar_select %p3315_p11, 1, 0 }
  0x44   : > { %s3914_s10 = scalar_select %p3319_p1, 1, 0 }
  0x45   : > { %3913 = sst [smem:[#allocation35_spill]] %s3912_s7  ;;  %s3846_s16 = sand.u32 1, %s3043_s29  }
  0x46   : > { %3915 = sst [smem:[#allocation36_spill]] %s3914_s10  ;;  %s3327_s27 = sshll.u32 %s3846_s16, 3 }
  0x47   : > { %s3852_s9 = sshll.u32 %s3059_s18, 7  ;;  %p3332_p4 = pnand %p2639_p8, %p3247_p3 }
  0x48   : > { %s531_s14 = sand.u32 1, %s3063_s19   ;;  %s3917_s1 = sld [smem:[#allocation39_spill]] }
  0x49   : > { %s535_s16 = scalar_lea.vmem [#allocation5], %s3327_s27  ;;  %p3347_p3 = pnand %p2639_p8, %p3282_p12 }
  0x4a   : > { %s542_s6 = sshll.u32 %s535_s16, 4  ;;  %s3354_s24 = scalar_lea.sflag [#allocation6], %s531_s14  ;;  %s3351_s6 = int_to_ptr.vmem [resolvable:$true] %s542_s6 }
  0x4b   : > { %p2789_p6 = pneg %p3332_p4 }
  0x4e   : > { %s3342_s10 = scalar_lea.hbm %s3917_s1, %s3852_s9  ;;  %s2792_s5 = scalar_lea.hbm %s3917_s1, 256 }
  0x4f   : > { %s2787_s7 = scalar_lea.hbm %s3342_s10, 128  ;;  %p2793_p12 = scmp.lt.u32.totalorder %s3342_s10, %s3917_s1 }
  0x50   : > { %p2788_p5 = scmp.ne.s32.totalorder %s3342_s10, %s2787_s7  ;;  %p2794_p8 = scmp.lt.u32.totalorder %s2792_s5, %s2787_s7 }
  0x51   : > { %p2796_p1 = scmp.lt.u32.totalorder %s2787_s7, %s3342_s10 }
  0x52   : > { %p2790_p9 = pnand %p2789_p6, %p2788_p5  ;;  %p2795_p0 = por %p2794_p8, %p2793_p12 }
  0x54   : > { %p2791_p10 = pneg %p2790_p9  ;;  %p2797_p2 = por %p2796_p1, %p2795_p0 }
  0x56   : > { %p2798_p11 = pnand %p2797_p2, %p2791_p10 }
  0x58   : > { %2801 = shalt.err (!%p2798_p11)
}
  0x59   : > { %s2802_s14 = scalar_lea.vmem %s3351_s6, 128  ;;  %s3065_s23 = smov [#allocation5]  }
  0x5a   : > { %p2803_p5 = scmp.ne.s32.totalorder %s3351_s6, %s2802_s14  ;;  %s2807_s16 = sshll.u32 %s3065_s23, 4  ;;  %s2808_s16 = int_to_ptr.vmem [resolvable:$false] %s2807_s16 }
  0x5b   : > { %s2809_s9 = scalar_lea.vmem %s2808_s16, 256  ;;  %p2810_p7 = scmp.lt.s32.totalorder %s3351_s6, %s2808_s16 }
  0x5c   : > { %p2805_p9 = pnand %p2803_p5, %p2789_p6  ;;  %p2811_p12 = scmp.lt.s32.totalorder %s2809_s9, %s2802_s14 }
  0x5e   : > { %p2806_p13 = pneg %p2805_p9  ;;  %p2812_p8 = por %p2811_p12, %p2810_p7 }
  0x60   : > { %p2813_p1 = pnand %p2812_p8, %p2806_p13 }
  0x62   : > { %2816 = shalt.err (!%p2813_p1)
}
  0x63   : > { %2628 = dma.hbm_to_vmem [thread:$0]  (!%p3332_p4), %s3342_s10, 128, %s3351_s6, %s3354_s24  }
  0x64   : > { %p648_p2 = scmp.lt.s32.totalorder %s3063_s19, 5  ;;  %p3919_p11 = scmp.ge.s32.totalorder %s3063_s19, 1 }
  0x65   : > { %s3921_s5 = sshll.u32 %s3059_s18, 7  ;;  %s3922_s23 = sld [smem:[#allocation38_spill]] }
  0x66   : > { %p3385_p0 = pnand %p3919_p11, %p648_p2  ;;  %s517_s1 = scalar_lea.vmem [#allocation2], %s3327_s27 }
  0x67   : > { %s524_s3 = sshll.u32 %s517_s1, 4  ;;  %s611_s4 = sand.u32 1, %s3031_s26   ;;  %s3398_s3 = int_to_ptr.vmem [resolvable:$true] %s524_s3 }
  0x68   : > { %s3920_s7 = scalar_select %p3385_p0, 1, 0 }
  0x69   : > { %s3400_s6 = sshll.u32 %s611_s4, 4  ;;  %s3924_s10 = sand.u32 1, %s3043_s29  }
  0x6a   : > { %s514_s19 = scalar_lea.sflag [#allocation3], %s3924_s10 }
  0x6b   : > { %s3923_s16 = smov %s3922_s23  ;;  %s3394_s9 = scalar_lea.hbm %s3922_s23, %s3921_s5 }
  0x6c   : > { %s2817_s2 = scalar_lea.hbm %s3394_s9, 128  ;;  %s2822_s14 = scalar_lea.hbm %s3923_s16, 256 }
  0x6d   : > { %p2818_p7 = scmp.ne.s32.totalorder %s3394_s9, %s2817_s2  ;;  %p2823_p5 = scmp.lt.u32.totalorder %s3394_s9, %s3923_s16 }
  0x6e   : > { %p2824_p9 = scmp.lt.u32.totalorder %s2822_s14, %s2817_s2  ;;  %p2826_p8 = scmp.lt.u32.totalorder %s2817_s2, %s3394_s9 }
  0x6f   : > { %p2820_p13 = pnand %p2818_p7, %p2789_p6 }
  0x70   : > { %p2825_p12 = por %p2824_p9, %p2823_p5 }
  0x71   : > { %p2821_p10 = pneg %p2820_p13 }
  0x72   : > { %p2827_p1 = por %p2826_p8, %p2825_p12 }
  0x74   : > { %p2828_p2 = pnand %p2827_p1, %p2821_p10 }
  0x76   : > { %2831 = shalt.err (!%p2828_p2)
}
  0x77   : > { %s2832_s1 = scalar_lea.vmem %s3398_s3, 128  ;;  %s3066_s4 = smov [#allocation2]  }
  0x78   : > { %p2833_p11 = scmp.ne.s32.totalorder %s3398_s3, %s2832_s1  ;;  %s2837_s10 = sshll.u32 %s3066_s4, 4  ;;  %s2838_s10 = int_to_ptr.vmem [resolvable:$false] %s2837_s10 }
  0x79   : > { %s2839_s5 = scalar_lea.vmem %s2838_s10, 256  ;;  %p2840_p0 = scmp.lt.s32.totalorder %s3398_s3, %s2838_s10 }
  0x7a   : > { %p2835_p7 = pnand %p2833_p11, %p2789_p6  ;;  %p2841_p5 = scmp.lt.s32.totalorder %s2839_s5, %s2832_s1 }
  0x7c   : > { %p2836_p13 = pneg %p2835_p7  ;;  %p2842_p9 = por %p2841_p5, %p2840_p0 }
  0x7e   : > { %p2843_p12 = pnand %p2842_p9, %p2836_p13 }
  0x80   : > { %2846 = shalt.err (!%p2843_p12)
}
  0x81   : > { %2625 = dma.hbm_to_vmem [thread:$0]  (!%p3332_p4), %s3394_s9, 128, %s3398_s3, %s514_s19  }
  0x82   : > { %s2490_s2 = sshll.u32 %s3055_s17, 8  ;;  %s3925_s11 = sld [smem:[#allocation49_spill]] }
  0x83   : > { %s613_s27 = scalar_lea.vmem [#allocation7], %s3400_s6  ;;  %p2849_p0 = pneg %p3347_p3 }
  0x84   : > { %s620_s1 = sshll.u32 %s613_s27, 4  ;;  %s3434_s1 = int_to_ptr.vmem [resolvable:$true] %s620_s1 }
  0x88   : > { %s3431_s23 = scalar_lea.hbm %s3925_s11, %s2490_s2  ;;  %s2852_s9 = scalar_lea.hbm %s3925_s11, 512 }
  0x89   : > { %s2847_s21 = scalar_lea.hbm %s3431_s23, 256  ;;  %p2853_p8 = scmp.lt.u32.totalorder %s3431_s23, %s3925_s11 }
  0x8a   : > { %p2848_p6 = scmp.ne.s32.totalorder %s3431_s23, %s2847_s21  ;;  %p2854_p1 = scmp.lt.u32.totalorder %s2852_s9, %s2847_s21 }
  0x8b   : > { %p2856_p11 = scmp.lt.u32.totalorder %s2847_s21, %s3431_s23 }
  0x8c   : > { %p2850_p4 = pnand %p2849_p0, %p2848_p6  ;;  %p2855_p2 = por %p2854_p1, %p2853_p8 }
  0x8e   : > { %p2851_p10 = pneg %p2850_p4  ;;  %p2857_p7 = por %p2856_p11, %p2855_p2 }
  0x90   : > { %p2858_p13 = pnand %p2857_p7, %p2851_p10 }
  0x92   : > { %2861 = shalt.err (!%p2858_p13)
}
  0x93   : > { %s2862_s6 = scalar_lea.vmem %s3434_s1, 256  ;;  %s3067_s5 = smov [#allocation7]  }
  0x94   : > { %p2863_p5 = scmp.ne.s32.totalorder %s3434_s1, %s2862_s6  ;;  %s2867_s2 = sshll.u32 %s3067_s5, 4  ;;  %s2868_s2 = int_to_ptr.vmem [resolvable:$false] %s2867_s2 }
  0x95   : > { %s2869_s15 = scalar_lea.vmem %s2868_s2, 512  ;;  %p2870_p6 = scmp.lt.s32.totalorder %s3434_s1, %s2868_s2 }
  0x96   : > { %p2865_p9 = pnand %p2863_p5, %p2849_p0  ;;  %p2871_p4 = scmp.lt.s32.totalorder %s2869_s15, %s2862_s6 }
  0x98   : > { %p2866_p12 = pneg %p2865_p9  ;;  %p2872_p8 = por %p2871_p4, %p2870_p6 }
  0x9a   : > { %p2873_p1 = pnand %p2872_p8, %p2866_p12 }
  0x9c   : > { %2876 = shalt.err (!%p2873_p1)
}
  0x9d   : > { %s3068_s14 = smov 64   ;;  %s3069_s27 = smov 4  }
  0x9e   : > { %2631 = dma.hbm_to_vmem [thread:$0]  (!%p3347_p3), %s3431_s23, 256, %s3434_s1, %s3354_s24, %s3068_s14, %s3068_s14, %s3069_s27  }
  0x9f   : > { %p3926_p0 = scmp.ne.s32.totalorder %s3920_s7, 0 }
  0xa1   : > { %652 = sbr.rel (%p3926_p0) target bundleno = 2568 (0xa08), region = 80 }
  0xa8   : > { %s3465_s21 = sand.u32 1, %s3039_s28   ;;  %p3928_p10 = scmp.ne.s32.totalorder %s3902_s8, 0 }
  0xa9   : > { %3927 = sst [smem:[#allocation37_spill]] %s3465_s21  ;;  %s3468_s3 = sshll.u32 %s3465_s21, 3 }
  0xaa   : > { %s655_s19 = scalar_lea.sflag [#allocation3], %s3465_s21 }
  0xab   : > { %2990 = dma.done.wait (%p3928_p10), %s655_s19, 128  }
  0xac   : > { %2992 = vsyncadd (%p3928_p10), %s655_s19, 4294967168  ;;  %s663_s24 = sand.u32 1, %s3230_s20  }
  0xad   : > { %s664_s12 = scalar_lea.sflag [#allocation6], %s663_s24 }
  0xae   : > { %2994 = dma.done.wait (%p3928_p10), %s664_s12, 128  }
  0xaf   : > { %2996 = vsyncadd (%p3928_p10), %s664_s12, 4294967168  ;;  %s674_s23 = sand.u32 1, %s3027_s25   ;;  %p3929_p3 = scmp.ne.s32.totalorder %s3906_s13, 0 }
  0xb0   : > { %s3483_s1 = sshll.u32 %s674_s23, 4 }
  0xb1   : > { %2998 = dma.done.wait (%p3929_p3), %s664_s12, 256  }
  0xb2   : > { %3000 = vsyncadd (%p3929_p3), %s664_s12, 4294967040  ;;  %s3858_s8 = sand.u32 1, %s3015_s22   ;;  %p784_p2 = scmp.lt.s32.totalorder %s3051_s0, 1 }
  0xb3   : > { %s3493_s20 = sshll.u32 %s3858_s8, 3  ;;  %p787_p11 = scmp.lt.s32.totalorder %s3047_s30, 1 }
  0xb4   : > { %s3498_s10 = scalar_select %p784_p2, %s3051_s0, 1 }
  0xb5   : > { %s3501_s6 = scalar_select %p787_p11, %s3047_s30, 1 }
  0xb6   : > { %s3932_s4 = sld [smem:[#allocation41_spill]]  ;;  %s3933_s9 = sld [smem:[#allocation43_spill]] }
  0xb7   : > { %s2491_s14 = sshll.u32 %s3501_s6, 4  ;;  %s3935_s15 = sld [smem:[#allocation45_spill]] }
  0xb8   : > { %s3936_s24 = sld [smem:[#allocation46_spill]]  ;;  %s3937_s23 = sld [smem:[#allocation47_spill]] }
  0xb9   : > { %s3938_s5 = sld [smem:[#allocation48_spill]]  ;;  %s3939_s17 = sld [smem:[#allocation50_spill]] }
  0xba   : > { %s2494_s29 = sshll.u32 %s3501_s6, 5  ;;  %s3941_s19 = sld [smem:[#allocation51_spill]] }
  0xbb   : > { %s3556_s8 = scalar_lea.vmem [#allocation8], %s3468_s3  ;;  %p2445_p7 = scmp.ne.s32.totalorder %s3047_s30, 0 }
  0xbc   : > { %s791_s13 = scalar_lea.vmem %s3932_s4, %s2491_s14  ;;  %s3518_s11 = scalar_lea.vmem %s3933_s9, %s2491_s14  ;;  %vm834_vm0 = vcmask (!%p2445_p7), 261120  }
  0xbd   : > { %s3527_s26 = scalar_lea.vmem %s3935_s15, %s2491_s14  ;;  %s3940_s14 = sld [smem:[#allocation52_spill]] }
  0xbe   : > { %s810_s12 = scalar_lea.vmem %s3936_s24, %s3501_s6  ;;  %s813_s25 = scalar_lea.vmem %s3937_s23, %s3501_s6 }
  0xbf   : > { %s816_s21 = scalar_lea.vmem %s3938_s5, %s3501_s6  ;;  %s819_s16 = scalar_lea.vmem %s3939_s17, %s3501_s6 }
  0xc0   : > { %s3553_s24 = scalar_lea.vmem %s3941_s19, %s2494_s29  ;;  %s783_s4 = scalar_lea.vmem [#allocation9], %s3493_s20 }
  0xc1   : > { %832 = sbr.rel (%p2445_p7) target bundleno = 200 (0xc8), region = 96  ;;  %s3942_s23 = scalar_lea.vmem (!%p2445_p7), [#allocation2], %s3468_s3 }
  0xc2   : > { %v833_v0 = vld [vmem:[%s3942_s23] sm:$0xff] (!%p2445_p7) }
  0xc3   : > { %s827_s2 = scalar_lea.vmem %s3940_s14, %s3501_s6  ;;  %835 = vst.msk [vmem:[%s3556_s8] sm:$0xff] (!%p2445_p7), %vm834_vm0, %v833_v0 }
  0xc8 PF: > { %v2757_v1 = vld [vmem:[%s791_s13] sm:$0xff]   ;;  %v3070_v2 = vmov 0.0   ;;  %v2758_v3 = vld [vmem:[%s791_s13 + $0x8] sm:$0xff]   ;;  %vm3071_vm1 = vmmov 0   ;;  %s3943_s22 = scalar_lea.vmem [#allocation5], %s3468_s3  ;;  %vm864_vm2 = vcmask 261120  }
  0xc9   : > { %2528 = vmatprep.subr.bf16.mxu1 %v3070_v2  ;;  %2544 = vmatprep.subr.mxu0 %v3070_v2  ;;  %v837_v5 = vld [vmem:[%s3943_s22] sm:$0xff]  ;;  %s3944_s3 = sld [smem:[#allocation42_spill]]  ;;  %v2759_v14 = vld [vmem:[%s3518_s11] sm:$0xff]   ;;  %v2760_v15 = vld [vmem:[%s3518_s11 + $0x8] sm:$0xff]   ;;  %vm1077_vm3 = vcmask 64512   ;;  %s3946_s9 = sld [smem:[#allocation40_spill]] }
  0xca   : > { %2529 = vmatpush3.bf16.msra.mxu1 %v2757_v1  ;;  %2532 = vmatprep.mubr.msk.bf16.mxu1 %vm3071_vm1, %v3070_v2  ;;  %v3568_v4 = vld [vmem:[%s3556_s8] sm:$0xff]  ;;  %s3948_s17 = sld [smem:[#allocation44_spill]]  ;;  %s3958_s7 = sld [smem:[#allocation35_spill]]  ;;  %vm2062_vm4 = vcmask 523264  }
  0xcb   : > { %2530 = vmatprep.subr.bf16.mxu1 %v3070_v2  ;;  %v839_v6 = vadd.f32 %v837_v5, %v3568_v4  ;;  %2546 = vmatprep.mubr.msk.f32.mxu0 %vm3071_vm1, %v3070_v2  ;;  %v908_v16 = vpack.c.bf16 %v3568_v4, %v3568_v4 }
  0xcd   : > { %v840_v7 = vpack.c.bf16 %v839_v6, %v839_v6 }
  0xce   : > { %2531 = vmatpush3.bf16.msra.mxu1 %v2758_v3 }
  0xcf   : > { %2536 = vmatprep.subr.bf16.mxu1 %v3070_v2  ;;  %s3945_s13 = scalar_lea.vmem %s3944_s3, %s3501_s6  ;;  %s3947_s5 = scalar_lea.vmem %s3946_s9, %s3498_s10 }
  0xd0   : > { %v2446_v8 = vld [vmem:[%s3945_s13] ss:$0 sm:$0xff]  ;;  %s3949_s28 = scalar_lea.vmem %s3948_s17, %s3501_s6  ;;  %s3955_s3 = sld [smem:[#allocation24_spill]] }
  0xd1   : > { %2533 = vmatmul.mubr.msk.bf16.vlgmr.msra.gmra.mrb[0].mxu1 %vm864_vm2, %v840_v7  ;;  %v2454_v33 = vld [vmem:[%s3947_s5] ss:$0 sm:$0xff]  ;;  %s2486_s9 = sshll.u32 %s3047_s30, 1  ;;  %s2142_s10 = sshll.u32 %s783_s4, 4  ;;  %s2143_s10 = int_to_ptr.vmem [resolvable:$true] %s2142_s10 }
  0xd2   : > { %2540 = vmatprep.mubr.msk.bf16.mxu1 %vm3071_vm1, %v3070_v2  ;;  %2537 = vmatpush3.bf16.msra.mxu1 %v2759_v14  ;;  %p3962_p5 = scmp.ne.s32.totalorder %s3958_s7, 0 }
  0xd3   : > { %2538 = vmatprep.subr.bf16.mxu1 %v3070_v2 }
  0xd6   : > { %2539 = vmatpush3.bf16.msra.mxu1 %v2760_v15  ;;  %s2138_s5 = sadd.s32 %s3955_s3, %s2486_s9 }
  0xd7   : > { %2559 = vmatprep.subr.mxu1 %v3070_v2 }
  0xd9   : > { %2541 = vmatmul.mubr.msk.bf16.vlgmr.msra.gmra.mrb[4].mxu1 %vm864_vm2, %v908_v16 }
  0xda   : > { %2561 = vmatprep.mubr.msk.f32.mxu1 %vm3071_vm1, %v3070_v2 }
 0x1a4   : > { %v902_v9 = vpop.f32.mrb[0].mxu1 }
 0x1a5   : > { %v2534_v10 = vpop.f32.mrb[1].mxu1  ;;  %v903_v11 = vadd.f32 %v2446_v8, %v902_v9  ;;  %v2450_v8 = vld [vmem:[%s3949_s28] ss:$0 sm:$0xff]  ;;  %s3959_s28 = sld [smem:[#allocation54_spill]] }
 0x1a6   : > { %v905_v12 = vpop.f32.mrb[2].mxu1 }
 0x1a7   : > { %975 = vxpose.xlu0.b32.start.end [1/1] (short) (narrow) %v903_v11, 64  ;;  %v2535_v13 = vpop.f32.mrb[3].mxu1 }
 0x1ab   : > { %s3960_s15 = smov %s3959_s28 }
 0x1ac   : > { %v969_v29 = vpop.f32.mrb[4].mxu1 }
 0x1ad   : > { %v2542_v30 = vpop.f32.mrb[5].mxu1  ;;  %v970_v9 = vadd.f32 %v2450_v8, %v969_v29 }
 0x1ae   : > { %v972_v31 = vpop.f32.mrb[6].mxu1 }
 0x1af   : > { %v2543_v32 = vpop.f32.mrb[7].mxu1 }
 0x227   : > { %v991_v17 = vpop.trf.xlu0 }
 0x228   : > { %1045 = vxpose.xlu0.b32.start.end [1/1] (short) (narrow) %v991_v17, 8 }
 0x22b   : > { %v992_v18 = vpop.trf.xlu0 }
 0x22c   : > { %1151 = vxpose.xlu1.b32.start.end [1/1] (short) (narrow) %v992_v18, 8 }
 0x22f   : > { %v993_v19 = vpop.trf.xlu0 }
 0x230   : > { %1256 = vxpose.xlu1.b32.start.end [1/1] (short) (narrow) %v993_v19, 8 }
 0x233   : > { %v994_v20 = vpop.trf.xlu0 }
 0x234   : > { %1361 = vxpose.xlu1.b32.start.end [1/1] (short) (narrow) %v994_v20, 8 }
 0x237   : > { %v995_v21 = vpop.trf.xlu0 }
 0x238   : > { %2545 = vmatpush3.msra.mxu0 %v995_v21 }
 0x239   : > { %2549 = vmatprep.subr.mxu0 %v3070_v2 }
 0x23b   : > { %v996_v22 = vpop.trf.xlu0 }
 0x23f   : > { %v997_v23 = vpop.trf.xlu0 }
 0x243   : > { %v998_v24 = vpop.trf.xlu0 }
 0x244   : > { %2560 = vmatpush3.msra.mxu1 %v998_v24 }
 0x245   : > { %2569 = vmatprep.subr.mxu1 %v3070_v2 }
 0x2a8   : > { %v1061_v25 = vpop.trf.xlu0 }
 0x2a9   : > { %2547 = vmatmul.mubr.msk.f32.vlgmr.msra.gmra.mrb[0].mxu0 %vm1077_vm3, %v1061_v25 }
 0x2aa   : > { %2550 = vmatpush3.msra.mxu0 %v996_v22  ;;  %2551 = vmatprep.mubr.msk.f32.mxu0 %vm3071_vm1, %v3070_v2 }
 0x2ab   : > { %2554 = vmatprep.subr.mxu0 %v3070_v2 }
 0x2ac   : > { %v1167_v26 = vpop.trf.xlu1 }
 0x2ad   : > { %2552 = vmatmul.mubr.msk.f32.vlgmr.msra.gmra.mrb[2].mxu0 %vm1077_vm3, %v1167_v26 }
 0x2ae   : > { %2555 = vmatpush3.msra.mxu0 %v997_v23  ;;  %2556 = vmatprep.mubr.msk.f32.mxu0 %vm3071_vm1, %v3070_v2 }
 0x2af   : > { %2564 = vmatprep.subr.mxu0 %v3070_v2 }
 0x2b0   : > { %v1272_v27 = vpop.trf.xlu1 }
 0x2b1   : > { %2557 = vmatmul.mubr.msk.f32.vlgmr.msra.gmra.mrb[4].mxu0 %vm1077_vm3, %v1272_v27 }
 0x2b2   : > { %2566 = vmatprep.mubr.msk.f32.mxu0 %vm3071_vm1, %v3070_v2 }
 0x2b4   : > { %v1377_v28 = vpop.trf.xlu1 }
 0x2b5   : > { %2562 = vmatmul.mubr.msk.f32.vlgmr.msra.gmra.mrb[8].mxu1 %vm1077_vm3, %v1377_v28 }
 0x2b6   : > { %2571 = vmatprep.mubr.msk.f32.mxu1 %vm3071_vm1, %v3070_v2 }
 0x37c   : > { %v1147_v34 = vpop.f32.mrb[0].mxu0 }
 0x37d   : > { %v1148_v35 = vadd.f32 %v2454_v33, %v1147_v34  ;;  %v2548_v36 = vpop.f32.mrb[1].mxu0  ;;  %v2761_v34 = vld [vmem:[%s3527_s26] sm:$0xff]  }
 0x37f   : > { %v1466_v37 = vsel %vm1077_vm3, %v1148_v35, -inf }
 0x380   : > { %1467 = vmax.xlane.f32.xlu1 %v1466_v37  ;;  %v1252_v38 = vpop.f32.mrb[2].mxu0 }
 0x381   : > { %v1253_v39 = vadd.f32 %v2454_v33, %v1252_v38  ;;  %v2553_v40 = vpop.f32.mrb[3].mxu0 }
 0x383   : > { %v1469_v41 = vsel %vm1077_vm3, %v1253_v39, -inf }
 0x384   : > { %1470 = vmax.xlane.f32.xlu0 %v1469_v41  ;;  %v1357_v42 = vpop.f32.mrb[4].mxu0 }
 0x385   : > { %v1358_v43 = vadd.f32 %v2454_v33, %v1357_v42  ;;  %v2558_v44 = vpop.f32.mrb[5].mxu0 }
 0x387   : > { %v1472_v45 = vsel %vm1077_vm3, %v1358_v43, -inf }
 0x388   : > { %1473 = vmax.xlane.f32.xlu1 %v1472_v45  ;;  %v1462_v46 = vpop.f32.mrb[8].mxu1 }
 0x389   : > { %v1463_v47 = vadd.f32 %v2454_v33, %v1462_v46  ;;  %v2563_v48 = vpop.f32.mrb[9].mxu1  ;;  %v2467_v46 = vld [vmem:[%s810_s12] ss:$0 sm:$0xff]  ;;  %s3951_s12 = scalar_lea.vmem [#allocation7], %s3483_s1 }
 0x38a   : > { %s3952_s27 = smov %s3951_s12 }
 0x38b   : > { %v1475_v49 = vsel %vm1077_vm3, %v1463_v47, -inf }
 0x38c   : > { %1476 = vmax.xlane.f32.xlu1 %v1475_v49 }
 0x40d   : > { %v1468_v50 = vpop.xlane.xlu1 %1467 }
 0x40e   : > { %v1478_v51 = vsub.f32 %v1148_v35, %v1468_v50  ;;  %v2762_v35 = vld [vmem:[%s3527_s26 + $0x8] sm:$0xff]  }
 0x410   : > { %v1482_v52 = vmul.f32 1.442695, %v1478_v51 }
 0x411   : > { %v1471_v53 = vpop.xlane.xlu0 %1470 }
 0x412   : > { %2769 = vpow2.f32 %v1482_v52  ;;  %v1479_v54 = vsub.f32 %v1253_v39, %v1471_v53 }
 0x414   : > { %v1484_v55 = vmul.f32 1.442695, %v1479_v54 }
 0x415   : > { %v1474_v56 = vpop.xlane.xlu1 %1473 }
 0x416   : > { %2771 = vpow2.f32 %v1484_v55  ;;  %v1480_v57 = vsub.f32 %v1358_v43, %v1474_v56 }
 0x418   : > { %v1486_v58 = vmul.f32 1.442695, %v1480_v57 }
 0x419   : > { %v1477_v59 = vpop.xlane.xlu1 %1476 }
 0x41a   : > { %2773 = vpow2.f32 %v1486_v58  ;;  %v1481_v60 = vsub.f32 %v1463_v47, %v1477_v59  ;;  %v2763_v59 = vld [vmem:[%s3951_s12] sm:$0xff]   ;;  %s2877_s12 = scalar_lea.vmem %s2143_s10, 128 }
 0x41b   : > { %p2878_p13 = scmp.ne.s32.totalorder %s2143_s10, %s2877_s12 }
 0x41c   : > { %v2770_v61 = vpop.eup %2769  ;;  %v1488_v62 = vmul.f32 1.442695, %v1481_v60  ;;  %v2764_v60 = vld [vmem:[%s3952_s27 + $0x8] sm:$0xff]   ;;  %s3072_s27 = smov [#allocation9]  }
 0x41d   : > { %v1490_v63 = vsel %vm1077_vm3, %v2770_v61, 0.0  ;;  %p2879_p9 = pnand %p2878_p13, %p3962_p5  ;;  %s2881_s1 = sshll.u32 %s3072_s27, 4  ;;  %s2882_s1 = int_to_ptr.vmem [resolvable:$false] %s2881_s1 }
 0x41e   : > { %2775 = vpow2.f32 %v1488_v62  ;;  %1491 = vadd.xlane.f32.xlu1 %v1490_v63  ;;  %s2883_s30 = scalar_lea.vmem %s2882_s1, 256  ;;  %p2884_p6 = scmp.lt.s32.totalorder %s2143_s10, %s2882_s1 }
 0x41f   : > { %p2880_p12 = pneg %p2879_p9  ;;  %p2885_p4 = scmp.lt.s32.totalorder %s2883_s30, %s2877_s12 }
 0x420   : > { %v2772_v0 = vpop.eup %2771 }
 0x421   : > { %v1493_v1 = vsel %vm1077_vm3, %v2772_v0, 0.0  ;;  %p2886_p8 = por %p2885_p4, %p2884_p6 }
 0x422   : > { %1494 = vadd.xlane.f32.xlu1 %v1493_v1 }
 0x423   : > { %p2887_p1 = pnand %p2886_p8, %p2880_p12 }
 0x424   : > { %v2774_v3 = vpop.eup %2773 }
 0x425   : > { %v1496_v5 = vsel %vm1077_vm3, %v2774_v3, 0.0 }
 0x426   : > { %1497 = vadd.xlane.f32.xlu1 %v1496_v5 }
 0x428   : > { %v2776_v6 = vpop.eup %2775 }
 0x429   : > { %v1499_v7 = vsel %vm1077_vm3, %v2776_v6, 0.0 }
 0x42a   : > { %1500 = vadd.xlane.f32.xlu1 %v1499_v7 }
 0x45d   : > { %1007 = vxpose.xlu1.b32.start.end [1/1] (short) (narrow) %v970_v9, 32 }
 0x4ab   : > { %v1492_v10 = vpop.xlane.xlu1 %1491 }
 0x4ac   : > { %2777 = vrcp.f32 %v1492_v10  ;;  %v2767_v10 = vld [vmem:[%s3553_s24 + $0x10] sm:$0xff]  }
 0x4af   : > { %v1495_v11 = vpop.xlane.xlu1 %1494 }
 0x4b0   : > { %2779 = vrcp.f32 %v1495_v11  ;;  %v2768_v11 = vld [vmem:[%s3553_s24 + $0x18] sm:$0xff]  }
 0x4b3   : > { %v1498_v12 = vpop.xlane.xlu1 %1497 }
 0x4b4   : > { %2781 = vrcp.f32 %v1498_v12  ;;  %v2473_v12 = vld [vmem:[%s819_s16] ss:$0 sm:$0xff] }
 0x4b6   : > { %v2778_v13 = vpop.eup %2777 }
 0x4b7   : > { %v1503_v14 = vmul.f32 %v2778_v13, %v2770_v61  ;;  %v1501_v15 = vpop.xlane.xlu1 %1500  ;;  %v2766_v61 = vld [vmem:[%s3553_s24 + $0x8] sm:$0xff]  }
 0x4b8   : > { %2783 = vrcp.f32 %v1501_v15 }
 0x4b9   : > { %2565 = vmatpush3.xpose.msk.msra.mxu0 %vm1077_vm3, %v1503_v14  ;;  %v1510_v21 = vsel %vm1077_vm3, %v1503_v14, 0.0 }
 0x4ba   : > { %v2780_v16 = vpop.eup %2779  ;;  %2574 = vmatprep.subr.mxu0 %v3070_v2 }
 0x4bb   : > { %v1505_v17 = vmul.f32 %v2780_v16, %v2772_v0 }
 0x4bd   : > { %2570 = vmatpush3.xpose.msk.msra.mxu1 %vm1077_vm3, %v1505_v17  ;;  %v1511_v20 = vsel %vm1077_vm3, %v1505_v17, 0.0 }
 0x4be   : > { %v2782_v18 = vpop.eup %2781  ;;  %2579 = vmatprep.subr.mxu1 %v3070_v2  ;;  %v1512_v24 = vadd.f32 %v1511_v20, %v1510_v21 }
 0x4bf   : > { %v1507_v19 = vmul.f32 %v2782_v18, %v2774_v3  ;;  %v2471_v3 = vld [vmem:[%s813_s25] ss:$0 sm:$0xff] }
 0x4c1   : > { %v1513_v22 = vsel %vm1077_vm3, %v1507_v19, 0.0 }
 0x4c2   : > { %v2784_v23 = vpop.eup %2783  ;;  %v1514_v26 = vadd.f32 %v1513_v22, %v1512_v24 }
 0x4c3   : > { %v1509_v25 = vmul.f32 %v2784_v23, %v2776_v6  ;;  %v2472_v6 = vld [vmem:[%s816_s21] ss:$0 sm:$0xff]  ;;  %s3957_s21 = sld [smem:[#allocation17_spill]] }
 0x4c5   : > { %v1515_v27 = vsel %vm1077_vm3, %v1509_v25, 0.0 }
 0x4c6   : > { %v1516_v28 = vadd.f32 %v1515_v27, %v1514_v26 }
 0x4c8   : > { %v1518_v29 = vmul.f32 0.25, %v1516_v28 }
 0x4c9   : > { %s3961_s26 = sand.u32 1, %s3957_s21  }
 0x4ca   : > { %1519 = vst.msk [vmem:[%s783_s4] sm:$0xff] %vm1077_vm3, %v1518_v29  ;;  %s2114_s14 = scalar_lea.sflag [#allocation10], %s3961_s26 }
 0x4dd   : > { %v1023_v30 = vpop.trf.xlu1 }
 0x4de   : > { %2567 = vmatmul.mubr.msk.f32.vlgmr.msra.gmra.mrb[6].mxu0 %vm1077_vm3, %v1023_v30 }
 0x4df   : > { %2575 = vmatpush3.xpose.msk.msra.mxu0 %vm1077_vm3, %v1507_v19  ;;  %2576 = vmatprep.mubr.msk.f32.mxu0 %vm3071_vm1, %v3070_v2 }
 0x4e0   : > { %2584 = vmatprep.subr.bf16.mxu0 %v3070_v2 }
 0x4e1   : > { %v1024_v31 = vpop.trf.xlu1 }
 0x4e2   : > { %2572 = vmatmul.mubr.msk.f32.vlgmr.msra.gmra.mrb[10].mxu1 %vm1077_vm3, %v1024_v31 }
 0x4e3   : > { %2580 = vmatpush3.xpose.msk.msra.mxu1 %vm1077_vm3, %v1509_v25  ;;  %2581 = vmatprep.mubr.msk.f32.mxu1 %vm3071_vm1, %v3070_v2 }
 0x4e4   : > { %2592 = vmatprep.subr.bf16.mxu1 %v3070_v2 }
 0x4e5   : > { %v1025_v32 = vpop.trf.xlu1 }
 0x4e6   : > { %2577 = vmatmul.mubr.msk.f32.vlgmr.msra.gmra.mrb[8].mxu0 %vm1077_vm3, %v1025_v32 }
 0x4e7   : > { %2588 = vmatprep.mubr.msk.bf16.mxu0 %vm3071_vm1, %v3070_v2  ;;  %2585 = vmatpush3.bf16.msra.mxu0 %v2761_v34 }
 0x4e8   : > { %2586 = vmatprep.subr.bf16.mxu0 %v3070_v2 }
 0x4e9   : > { %v1026_v33 = vpop.trf.xlu1 }
 0x4ea   : > { %2582 = vmatmul.mubr.msk.f32.vlgmr.msra.gmra.mrb[12].mxu1 %vm1077_vm3, %v1026_v33 }
 0x4eb   : > { %2596 = vmatprep.mubr.msk.bf16.mxu1 %vm3071_vm1, %v3070_v2  ;;  %2587 = vmatpush3.bf16.msra.mxu0 %v2762_v35 }
 0x4ec   : > { %2600 = vmatprep.subr.bf16.mxu0 %v3070_v2  ;;  %2593 = vmatpush3.bf16.msra.mxu1 %v2763_v59 }
 0x4ed   : > { %2594 = vmatprep.subr.bf16.mxu1 %v3070_v2 }
 0x4f0   : > { %2595 = vmatpush3.bf16.msra.mxu1 %v2764_v60 }
 0x5b1   : > { %v1592_v36 = vpop.f32.mrb[6].mxu0 }
 0x5b2   : > { %1824 = vxpose.xlu0.b32.start [1/4] (short) (narrow) %v1592_v36, 8  ;;  %v2568_v37 = vpop.f32.mrb[7].mxu0 }
 0x5b5   : > { %v1668_v38 = vpop.f32.mrb[10].mxu1 }
 0x5b6   : > { %1825 = vxpose.xlu0.b32.cont [2/4] (short) (narrow) %v1668_v38, 8  ;;  %v2573_v39 = vpop.f32.mrb[11].mxu1 }
 0x5b9   : > { %v1744_v40 = vpop.f32.mrb[8].mxu0 }
 0x5ba   : > { %v2578_v41 = vpop.f32.mrb[9].mxu0  ;;  %1826 = vxpose.xlu0.b32.cont [3/4] (short) (narrow) %v1744_v40, 8 }
 0x5bd   : > { %v1820_v42 = vpop.f32.mrb[12].mxu1 }
 0x5be   : > { %1827 = vxpose.xlu0.b32.end [4/4] (short) (narrow) %v1820_v42, 8  ;;  %v2583_v43 = vpop.f32.mrb[13].mxu1 }
 0x632   : > { %v1840_v44 = vpop.trf.xlu0 }
 0x633   : > { %v1856_v45 = vpack.c.bf16 %v1840_v44, %v1840_v44 }
 0x635   : > { %2589 = vmatmul.mubr.msk.bf16.vlgmr.msra.gmra.mrb[12].mxu0 %vm864_vm2, %v1856_v45 }
 0x636   : > { %2608 = vmatprep.mubr.msk.bf16.mxu0 %vm3071_vm1, %v3070_v2 }
 0x708   : > { %v1917_v47 = vpop.f32.mrb[12].mxu0 }
 0x709   : > { %v1918_v48 = vadd.f32 %v2467_v46, %v1917_v47  ;;  %v2590_v49 = vpop.f32.mrb[13].mxu0 }
 0x70a   : > { %v1920_v50 = vpop.f32.mrb[14].mxu0 }
 0x70b   : > { %v2591_v51 = vpop.f32.mrb[15].mxu0  ;;  %v1923_v52 = vadd.f32 %v1918_v48, %v3568_v4  ;;  %v2765_v4 = vld [vmem:[%s3553_s24] sm:$0xff]   ;;  %s2487_s24 = sshll.u32 %s2138_s5, 7 }
 0x70c   : > { %2601 = vmatpush3.bf16.msra.mxu0 %v2765_v4  ;;  %s3705_s16 = scalar_lea.hbm %s3959_s28, %s2487_s24 }
 0x70d   : > { %v1926_v53 = vsel %vm864_vm2, %v1923_v52, 0.0  ;;  %2602 = vmatprep.subr.bf16.mxu0 %v3070_v2 }
 0x70e   : > { %1927 = vadd.xlane.f32.xlu1 %v1926_v53 }
 0x710   : > { %2603 = vmatpush3.bf16.msra.mxu0 %v2766_v61 }
 0x711   : > { %2604 = vmatprep.subr.bf16.mxu0 %v3070_v2 }
 0x714   : > { %2605 = vmatpush3.bf16.msra.mxu0 %v2767_v10 }
 0x715   : > { %2606 = vmatprep.subr.bf16.mxu0 %v3070_v2 }
 0x718   : > { %2607 = vmatpush3.bf16.msra.mxu0 %v2768_v11 }
 0x79b   : > { %v1928_v54 = vpop.xlane.xlu1 %1927 }
 0x79c   : > { %v1930_v55 = vmul.f32 0.03125, %v1928_v54 }
 0x79e   : > { %v1931_v56 = vsub.f32 %v1923_v52, %v1930_v55 }
 0x7a0   : > { %v1932_v57 = vmul.f32 %v1931_v56, %v1931_v56 }
 0x7a2   : > { %v1933_v58 = vsel %vm864_vm2, %v1932_v57, 0.0 }
 0x7a3   : > { %1934 = vadd.xlane.f32.xlu0 %v1933_v58 }
 0x830   : > { %v1935_v62 = vpop.xlane.xlu0 %1934 }
 0x831   : > { %v1936_v63 = vmul.f32 0.03125, %v1935_v62 }
 0x833   : > { %v1937_v0 = vadd.f32 1e-05, %v1936_v63 }
 0x835   : > { %2785 = vrsqrt.f32 %v1937_v0 }
 0x83f   : > { %v2786_v1 = vpop.eup %2785 }
 0x840   : > { %v1939_v5 = vmul.f32 %v2786_v1, %v1931_v56 }
 0x842   : > { %v1946_v7 = vmul.f32 %v2471_v3, %v1939_v5 }
 0x844   : > { %v1953_v8 = vadd.f32 %v2472_v6, %v1946_v7 }
 0x846   : > { %v1954_v9 = vpack.c.bf16 %v1953_v8, %v1953_v8 }
 0x848   : > { %2597 = vmatmul.mubr.msk.bf16.vlgmr.msra.gmra.mrb[16].mxu1 %vm864_vm2, %v1954_v9 }
 0x91b   : > { %v2015_v13 = vpop.f32.mrb[16].mxu1 }
 0x91c   : > { %v2016_v14 = vadd.f32 %v2473_v12, %v2015_v13  ;;  %v2598_v15 = vpop.f32.mrb[17].mxu1 }
 0x91d   : > { %v2018_v16 = vpop.f32.mrb[18].mxu1 }
 0x91e   : > { %v2021_v17 = vmax.f32 %v2016_v14, 0.0  ;;  %v2599_v18 = vpop.f32.mrb[19].mxu1 }
 0x920   : > { %v2022_v19 = vpack.c.bf16 %v2021_v17, %v2021_v17 }
 0x922   : > { %2609 = vmatmul.mubr.msk.bf16.vlgmr.msra.gmra.mrb[16].mxu0 %vm2062_vm4, %v2022_v19 }
 0x923   : > { %2890 = shalt.err (!%p2887_p1)
}
 0x924   : > { %s2891_s20 = scalar_lea.hbm %s3705_s16, 128  ;;  %s2895_s23 = scalar_lea.hbm %s3960_s15, 512 }
 0x925   : > { %p2892_p0 = scmp.ne.s32.totalorder %s3705_s16, %s2891_s20  ;;  %p2896_p2 = scmp.lt.u32.totalorder %s3705_s16, %s3960_s15 }
 0x926   : > { %p2897_p11 = scmp.lt.u32.totalorder %s2895_s23, %s2891_s20  ;;  %p2899_p13 = scmp.lt.u32.totalorder %s2891_s20, %s3705_s16 }
 0x927   : > { %p2893_p10 = pnand %p2892_p0, %p3962_p5 }
 0x928   : > { %p2898_p7 = por %p2897_p11, %p2896_p2 }
 0x929   : > { %p2894_p3 = pneg %p2893_p10 }
 0x92a   : > { %p2900_p9 = por %p2899_p13, %p2898_p7 }
 0x92c   : > { %p2901_p12 = pnand %p2900_p9, %p2894_p3 }
 0x92e   : > { %2904 = shalt.err (!%p2901_p12)
}
 0x92f   : > { %s3963_s0 = sld [smem:[#allocation37_spill]]  ;;  %s3965_s21 = sld [smem:[#allocation32_spill]]  ;;  %v2477_v2 = vld [vmem:[%s827_s2] ss:$0 sm:$0xff] }
 0x930   : > { %2619 = dma.vmem_to_hbm [thread:$0]  (%p3962_p5), %s2143_s10, 128, %s3705_s16, %s2114_s14  }
 0x931   : > { %s2485_s9 = sshll.u32 %s3955_s3, 7  ;;  %s2127_s5 = sshll.u32 %s3556_s8, 4  ;;  %s3738_s5 = int_to_ptr.vmem [resolvable:$true] %s2127_s5 }
 0x932   : > { %s3966_s18 = sld [smem:[#allocation53_spill]]  ;;  %s2905_s2 = scalar_lea.vmem %s3738_s5, 128 }
 0x933   : > { %p2906_p5 = scmp.ne.s32.totalorder %s3738_s5, %s2905_s2  ;;  %s3073_s3 = smov [#allocation8]  }
 0x934   : > { %s2909_s10 = sshll.u32 %s3073_s3, 4  ;;  %s2910_s10 = int_to_ptr.vmem [resolvable:$false] %s2909_s10 }
 0x935   : > { %s2109_s6 = scalar_lea.sflag [#allocation4], %s3963_s0  ;;  %p3968_p6 = scmp.ne.s32.totalorder %s3965_s21, 0 }
 0x936   : > { %s2911_s28 = scalar_lea.vmem %s2910_s10, 256  ;;  %p2912_p1 = scmp.lt.s32.totalorder %s3738_s5, %s2910_s10 }
 0x937   : > { %p2907_p4 = pnand %p2906_p5, %p3968_p6  ;;  %p2913_p0 = scmp.lt.s32.totalorder %s2911_s28, %s2905_s2 }
 0x938   : > { %s3967_s12 = smov %s3966_s18  ;;  %s3736_s17 = scalar_lea.hbm %s3966_s18, %s2485_s9 }
 0x939   : > { %p2908_p8 = pneg %p2907_p4  ;;  %p2914_p10 = por %p2913_p0, %p2912_p1 }
 0x93b   : > { %p2915_p3 = pnand %p2914_p10, %p2908_p8 }
 0x9f5   : > { %v2100_v20 = vpop.f32.mrb[16].mxu0 }
 0x9f6   : > { %v2101_v21 = vadd.f32 %v2477_v2, %v2100_v20  ;;  %v2610_v22 = vpop.f32.mrb[17].mxu0 }
 0x9f7   : > { %v2103_v23 = vpop.f32.mrb[18].mxu0 }
 0x9f8   : > { %v2106_v24 = vadd.f32 %v2101_v21, %v1953_v8  ;;  %v2611_v25 = vpop.f32.mrb[19].mxu0 }
 0x9fa   : > { %2107 = vst.msk [vmem:[%s3556_s8] sm:$0xff] %vm864_vm2, %v2106_v24 }
 0x9fb   : > { %2918 = shalt.err (!%p2915_p3)
}
 0x9fc   : > { %s2919_s8 = scalar_lea.hbm %s3736_s17, 128  ;;  %s2923_s14 = scalar_lea.hbm %s3967_s12, 256 }
 0x9fd   : > { %p2920_p2 = scmp.ne.s32.totalorder %s3736_s17, %s2919_s8  ;;  %p2924_p13 = scmp.lt.u32.totalorder %s3736_s17, %s3967_s12 }
 0x9fe   : > { %p2925_p9 = scmp.lt.u32.totalorder %s2923_s14, %s2919_s8  ;;  %p2927_p5 = scmp.lt.u32.totalorder %s2919_s8, %s3736_s17 }
 0x9ff   : > { %p2921_p11 = pnand %p2920_p2, %p3968_p6 }
 0xa00   : > { %p2926_p12 = por %p2925_p9, %p2924_p13 }
 0xa01   : > { %p2922_p7 = pneg %p2921_p11 }
 0xa02   : > { %p2928_p4 = por %p2927_p5, %p2926_p12 }
 0xa04   : > { %p2929_p8 = pnand %p2928_p4, %p2922_p7 }
 0xa06   : > { %2932 = shalt.err (!%p2929_p8)
}
 0xa07   : > { %2618 = dma.vmem_to_hbm [thread:$0]  (%p3968_p6), %s3738_s5, 128, %s3736_s17, %s2109_s6  }
 0xa08 PF: > { %s3969_s30 = sld [smem:[#allocation27_spill]]  ;;  %s3970_s20 = sld [smem:[#allocation21_spill]] }
 0xa09   : > { %s3971_s4 = sld [smem:[#allocation33_spill]] }
 0xa0e   : > { %p2640_p1 = scmp.ge.s32.totalorder %s3969_s30, 2  ;;  %s2154_s19 = sand.u32 1, %s3970_s20  }
 0xa0f   : > { %p3972_p0 = scmp.ne.s32.totalorder %s3971_s4, 0  ;;  %s2155_s23 = scalar_lea.sflag [#allocation4], %s2154_s19 }
 0xa11   : > { %p2633_p10 = pnand %p2640_p1, %p3972_p0 }
 0xa13   : > { %3002 = dma.done.wait (!%p2633_p10), %s2155_s23, 128  }
 0xa14   : > { %3004 = vsyncadd (!%p2633_p10), %s2155_s23, 4294967168  ;;  %s3973_s22 = sld [smem:[#allocation16_spill]]  ;;  %s3974_s29 = sld [smem:[#allocation36_spill]] }
 0xa1a   : > { %s2163_s0 = sand.u32 1, %s3973_s22   ;;  %p3975_p3 = scmp.ne.s32.totalorder %s3974_s29, 0 }
 0xa1b   : > { %s2164_s25 = scalar_lea.sflag [#allocation10], %s2163_s0 }
 0xa1c   : > { %p2636_p2 = pnand %p2640_p1, %p3975_p3 }
 0xa1e   : > { %3006 = dma.done.wait (!%p2636_p2), %s2164_s25, 128  }
 0xa1f   : > { %3008 = vsyncadd (!%p2636_p2), %s2164_s25, 4294967168  ;;  %s39_s19 = sadd.s32 1, %s3969_s30   ;;  %s3977_s21 = sld [smem:[#allocation17_spill]] }
 0xa20   : > { %p3772_p6 = scmp.ge.s32.totalorder %s39_s19, 6   ;;  %s3978_s22 = sld [smem:[#allocation18_spill]] }
 0xa21   : > { %s3979_s23 = sld [smem:[#allocation34_spill]]  ;;  %s3980_s24 = sld [smem:[#allocation19_spill]] }
 0xa22   : > { %s3981_s25 = sld [smem:[#allocation20_spill]]  ;;  %s3982_s26 = sld [smem:[#allocation30_spill]] }
 0xa23   : > { %s3983_s27 = sld [smem:[#allocation22_spill]]  ;;  %s3984_s28 = sld [smem:[#allocation23_spill]] }
 0xa24   : > { %s3985_s29 = sld [smem:[#allocation31_spill]]  ;;  %s3986_s30 = sld [smem:[#allocation25_spill]] }
 0xa25   : > { %s3987_s0 = sld [smem:[#allocation26_spill]]  ;;  %s3988_s17 = sld [smem:[#allocation28_spill]] }
 0xa26   : > { %s3989_s18 = sld [smem:[#allocation29_spill]]  ;;  %38 = sbr.rel (!%p3772_p6) target bundleno = 32 (0x20), region = 206 }
 0xa2d   :  { %2169 = vsyncpa [#allocation3], 1 }
 0xa2e   :  { %2171 = vsyncpa [#allocation3 + $0x1], 1 }
 0xa2f   :  { %2172 = vsyncpa [#allocation6], 1 }
 0xa30   :  { %2174 = vsyncpa [#allocation6 + $0x1], 1 }
 0xa31   :  { %2175 = vsyncpa [#allocation4], 1 }
 0xa32   :  { %2177 = vsyncpa [#allocation4 + $0x1], 1 }
 0xa33   :  { %2178 = vsyncpa [#allocation10], 1 }
 0xa34   :  { %2180 = vsyncpa [#allocation10 + $0x1], 1 }

</bundles_post_ra>
